<compile_context>
chip_gen: v7x
topology: tpu7x:2x2x1
jax: 0.10.0
libtpu: 0.0.40
codegen_flags: <defaults>
</compile_context>

<pallas_src>
import jax
import jax.numpy as jnp
from jax.experimental import pallas as pl
from jax.experimental.pallas import tpu as pltpu

_LANE = 128


def _round_up(n: int, m: int) -> int:
    return -(-n // m) * m


def _generator_mlp_kernel(x_ref, y_ref,
                          tbl_ref, b1_ref, w1_ref,
                          w2_ref, b2_ref,
                          w3_ref, b3_ref,
                          w4_ref, b4_ref,
                          o_ref):
    """Fused MLP tile: (Linear -> LeakyReLU(0.2)) x3 -> Linear -> Tanh.

    Matmul operands are bf16 (MXU peak), accumulation is fp32.  The per-row
    class bias is reconstructed in-kernel from the resident (classes_p, 256)
    table via an exact one-hot selection matmul.
    """
    slope = jnp.float32(0.2)

    def leaky(h):
        # max(h, 0.2*h) == LeakyReLU(0.2) for 0 < slope < 1; 2 VALU ops/elem.
        return jnp.maximum(h, slope * h)

    # ---- rebuild per-row class bias from the resident table -----------------
    labels = y_ref[...]                               # (TB, 1) int32
    tb = labels.shape[0]
    classes_p = tbl_ref.shape[0]
    onehot = (labels == jax.lax.broadcasted_iota(
        jnp.int32, (tb, classes_p), 1)).astype(jnp.bfloat16)
    cls_bias = jnp.dot(onehot, tbl_ref[...],
                       preferred_element_type=jnp.float32)  # (TB, 256)

    # ---- layer 1: x @ W1_noise + (embed @ W1_cls)[y] + b1 --------------------
    h = jnp.dot(x_ref[...], w1_ref[...], preferred_element_type=jnp.float32)
    h = leaky(h + cls_bias + b1_ref[...])

    # ---- layer 2: (TB, 256) @ (256, 512) -------------------------------------
    h = jnp.dot(h.astype(jnp.bfloat16), w2_ref[...],
                preferred_element_type=jnp.float32)
    h = leaky(h + b2_ref[...])

    # ---- layer 3: (TB, 512) @ (512, 1024) ------------------------------------
    h = jnp.dot(h.astype(jnp.bfloat16), w3_ref[...],
                preferred_element_type=jnp.float32)
    h = leaky(h + b3_ref[...])

    # ---- layer 4: (TB, 1024) @ (1024, image_dim_p), lane-dense bf16 store ----
    h = jnp.dot(h.astype(jnp.bfloat16), w4_ref[...],
                preferred_element_type=jnp.float32)
    o_ref[...] = jnp.tanh(h + b4_ref[...]).astype(o_ref.dtype)


def init_generator_params(key, noise_dim: int, image_dim: int, num_classes: int):
    """Deterministic parameter init (matches module shapes, not a checkpoint)."""
    keys = jax.random.split(key, 9)
    in_dim = noise_dim + num_classes
    dims = [(in_dim, 256), (256, 512), (512, 1024), (1024, image_dim)]

    params = {"embed": jax.random.normal(keys[0], (num_classes, num_classes),
                                         dtype=jnp.float32)}
    for li, (di, do) in enumerate(dims):
        bound = 1.0 / jnp.sqrt(jnp.float32(di))
        params[f"w{li + 1}"] = jax.random.uniform(
            keys[1 + 2 * li], (di, do), minval=-bound, maxval=bound,
            dtype=jnp.float32)
        params[f"b{li + 1}"] = jax.random.uniform(
            keys[2 + 2 * li], (1, do), minval=-bound, maxval=bound,
            dtype=jnp.float32)
    return params


def _pick_tile_batch(batch: int) -> int:
    if batch < 512:
        # bf16 x-tile needs >= 16 sublane rows.
        return max(16, _round_up(batch, 16))
    if batch < 2048:
        # Split into >= 2 tiles so both v7x TensorCores get batch work.
        return _round_up(-(-batch // 2), 256)
    # Large batches: TB=1024 amortizes the ~0.35 us/step pipeline overhead.
    return 1024


def generator_forward(params, x, y, *, tile_batch=None):
    """x: (B, noise_dim) fp32 noise, y: (B,) int labels -> (B, image_dim) bf16."""
    batch, noise_dim = x.shape
    num_classes = params["embed"].shape[0]
    image_dim = params["w4"].shape[1]
    image_dim_p = _round_up(image_dim, _LANE)

    # ---- fold Embedding + concat into layer 1 (tiny plain-JAX glue) ---------
    #   [x ; embed[y]] @ W1 + b1 == x @ W1_noise + (embed @ W1_cls)[y] + b1
    w1_noise = params["w1"][:noise_dim]                      # (noise_dim, 256)
    w1_cls = params["w1"][noise_dim:]                        # (classes, 256)
    cls_table = params["embed"] @ w1_cls                     # (classes, 256) fp32
    classes_p = _round_up(num_classes, _LANE)
    tbl = jnp.pad(cls_table,
                  ((0, classes_p - num_classes), (0, 0))).astype(jnp.bfloat16)
    b1 = params["b1"]                                        # (1, 256) fp32

    # ---- pad the output layer to a lane-dense width --------------------------
    pad_n = image_dim_p - image_dim
    w4 = jnp.pad(params["w4"], ((0, 0), (0, pad_n)))
    b4 = jnp.pad(params["b4"], ((0, 0), (0, pad_n)))

    # ---- batch tiling ---------------------------------------------------------
    if tile_batch is None:
        tile_batch = _pick_tile_batch(batch)
    tile_batch = min(tile_batch, 1024)
    padded_batch = _round_up(batch, tile_batch)
    grid = (padded_batch // tile_batch,)

    x_p = jnp.pad(x, ((0, padded_batch - batch), (0, 0))).astype(jnp.bfloat16)
    y_p = jnp.pad(y.astype(jnp.int32), (0, padded_batch - batch)).reshape(-1, 1)

    # bf16 matmul operands; biases stay fp32.
    w1n_b = w1_noise.astype(jnp.bfloat16)
    w2_b = params["w2"].astype(jnp.bfloat16)
    w3_b = params["w3"].astype(jnp.bfloat16)
    w4_b = w4.astype(jnp.bfloat16)

    def resident(a):
        # Full-array block, same block every grid step -> stays VMEM-resident.
        return pl.BlockSpec(a.shape, lambda i: (0, 0))

    out = pl.pallas_call(
        _generator_mlp_kernel,
        out_shape=jax.ShapeDtypeStruct((padded_batch, image_dim_p),
                                       jnp.bfloat16),
        grid=grid,
        in_specs=[
            pl.BlockSpec((tile_batch, noise_dim), lambda i: (i, 0)),   # x
            pl.BlockSpec((tile_batch, 1), lambda i: (i, 0)),           # labels
            resident(tbl), resident(b1), resident(w1n_b),
            resident(w2_b), resident(params["b2"]),
            resident(w3_b), resident(params["b3"]),
            resident(w4_b), resident(b4),
        ],
        out_specs=pl.BlockSpec((tile_batch, image_dim_p), lambda i: (i, 0)),
        compiler_params=pltpu.CompilerParams(
            dimension_semantics=("parallel",),
            vmem_limit_bytes=32 * 1024 * 1024),
    )(x_p, y_p, tbl, b1, w1n_b, w2_b, params["b2"], w3_b, params["b3"],
      w4_b, b4)

    return out[:batch, :image_dim]


def generator_reference(params, x, y):
    """Pure-JAX fp32 reference (matches the PyTorch module semantics)."""
    emb = jnp.take(params["embed"], y, axis=0)
    h = jnp.concatenate([x, emb], axis=1)
    for li in range(1, 4):
        h = h @ params[f"w{li}"] + params[f"b{li}"]
        h = jnp.where(h > 0, h, 0.2 * h)
    h = h @ params["w4"] + params["b4"]
    return jnp.tanh(h)


if __name__ == "__main__":
    noise_dim = 32
    image_dim = 64
    num_classes = 10
    batch = 8

    key = jax.random.PRNGKey(0)
    k_params, k_noise, k_label = jax.random.split(key, 3)

    params = init_generator_params(k_params, noise_dim, image_dim, num_classes)
    x = jax.random.normal(k_noise, (batch, noise_dim), dtype=jnp.float32)
    y = jax.random.randint(k_label, (batch,), 0, num_classes, dtype=jnp.int32)

    out = generator_forward(params, x, y)
    out = jax.block_until_ready(out)

    ref = generator_reference(params, x, y)
    assert out.shape == (batch, image_dim), out.shape
    # bf16 matmul operands / bf16 class-bias table / bf16 output store with
    # fp32 accumulation -> loosened tolerance vs the fp32 reference.
    assert jnp.allclose(out.astype(jnp.float32), ref, atol=4e-2, rtol=4e-2), \
        "mismatch vs reference"

    print("KERNEL_OK")
</pallas_src>

<mosaic_0001>
module attributes {stable_mosaic.version = 11 : i64} {
  func.func @_generator_mlp_kernel(%arg0: i32, %arg1: memref<16x32xbf16, #tpu.memory_space<vmem>>, %arg2: memref<16x1xi32, #tpu.memory_space<vmem>>, %arg3: memref<128x256xbf16, #tpu.memory_space<vmem>>, %arg4: memref<1x256xf32, #tpu.memory_space<vmem>>, %arg5: memref<32x256xbf16, #tpu.memory_space<vmem>>, %arg6: memref<256x512xbf16, #tpu.memory_space<vmem>>, %arg7: memref<1x512xf32, #tpu.memory_space<vmem>>, %arg8: memref<512x1024xbf16, #tpu.memory_space<vmem>>, %arg9: memref<1x1024xf32, #tpu.memory_space<vmem>>, %arg10: memref<1024x128xbf16, #tpu.memory_space<vmem>>, %arg11: memref<1x128xf32, #tpu.memory_space<vmem>>, %arg12: memref<16x128xbf16, #tpu.memory_space<vmem>>) attributes {dimension_semantics = [#tpu.dimension_semantics<parallel>], iteration_bounds = array<i64: 1>, scalar_prefetch = 0 : i64, scratch_operands = 0 : i64, tpu.core_type = #tpu.core_type<tc>, window_params = [{transform_indices = @transform_0, window_bounds = array<i64: 16, 32>}, {transform_indices = @transform_1, window_bounds = array<i64: 16, 1>}, {pipeline_mode = #tpu.pipeline_mode<synchronous>, transform_indices = @transform_2, window_bounds = array<i64: 128, 256>}, {pipeline_mode = #tpu.pipeline_mode<synchronous>, transform_indices = @transform_3, window_bounds = array<i64: 1, 256>}, {pipeline_mode = #tpu.pipeline_mode<synchronous>, transform_indices = @transform_4, window_bounds = array<i64: 32, 256>}, {pipeline_mode = #tpu.pipeline_mode<synchronous>, transform_indices = @transform_5, window_bounds = array<i64: 256, 512>}, {pipeline_mode = #tpu.pipeline_mode<synchronous>, transform_indices = @transform_6, window_bounds = array<i64: 1, 512>}, {pipeline_mode = #tpu.pipeline_mode<synchronous>, transform_indices = @transform_7, window_bounds = array<i64: 512, 1024>}, {pipeline_mode = #tpu.pipeline_mode<synchronous>, transform_indices = @transform_8, window_bounds = array<i64: 1, 1024>}, {pipeline_mode = #tpu.pipeline_mode<synchronous>, transform_indices = @transform_9, window_bounds = array<i64: 1024, 128>}, {pipeline_mode = #tpu.pipeline_mode<synchronous>, transform_indices = @transform_10, window_bounds = array<i64: 1, 128>}, {transform_indices = @transform_11, window_bounds = array<i64: 16, 128>}]} {
    %c0 = arith.constant 0 : index
    %c0_0 = arith.constant 0 : index
    %0 = vector.load %arg2[%c0, %c0_0] : memref<16x1xi32, #tpu.memory_space<vmem>>, vector<16x1xi32>
    %1 = tpu.iota {dimensions = array<i32: 1>} : vector<16x128xi32>
    %2 = vector.broadcast %0 : vector<16x1xi32> to vector<16x128xi32>
    %3 = arith.cmpi eq, %2, %1 : vector<16x128xi32>
    %4 = arith.extui %3 : vector<16x128xi1> to vector<16x128xi32>
    %5 = arith.sitofp %4 : vector<16x128xi32> to vector<16x128xf32>
    %6 = arith.truncf %5 : vector<16x128xf32> to vector<16x128xbf16>
    %c0_1 = arith.constant 0 : index
    %c0_2 = arith.constant 0 : index
    %7 = vector.load %arg3[%c0_1, %c0_2] : memref<128x256xbf16, #tpu.memory_space<vmem>>, vector<128x256xbf16>
    %cst = arith.constant dense<0.000000e+00> : vector<16x256xf32>
    %8 = tpu.matmul %6, %7, %cst {dimension_numbers = #tpu.dot_dimension_numbers<[1], [0], [0], [1], [0, 0, 1, 1], [], []>} : vector<16x128xbf16>, vector<128x256xbf16>, vector<16x256xf32> -> vector<16x256xf32>
    %c0_3 = arith.constant 0 : index
    %c0_4 = arith.constant 0 : index
    %9 = vector.load %arg1[%c0_3, %c0_4] : memref<16x32xbf16, #tpu.memory_space<vmem>>, vector<16x32xbf16>
    %c0_5 = arith.constant 0 : index
    %c0_6 = arith.constant 0 : index
    %10 = vector.load %arg5[%c0_5, %c0_6] : memref<32x256xbf16, #tpu.memory_space<vmem>>, vector<32x256xbf16>
    %cst_7 = arith.constant dense<0.000000e+00> : vector<16x256xf32>
    %11 = tpu.matmul %9, %10, %cst_7 {dimension_numbers = #tpu.dot_dimension_numbers<[1], [0], [0], [1], [0, 0, 1, 1], [], []>} : vector<16x32xbf16>, vector<32x256xbf16>, vector<16x256xf32> -> vector<16x256xf32>
    %12 = arith.addf %11, %8 : vector<16x256xf32>
    %c0_8 = arith.constant 0 : index
    %c0_9 = arith.constant 0 : index
    %13 = vector.load %arg4[%c0_8, %c0_9] : memref<1x256xf32, #tpu.memory_space<vmem>>, vector<1x256xf32>
    %14 = vector.broadcast %13 : vector<1x256xf32> to vector<16x256xf32>
    %15 = arith.addf %12, %14 : vector<16x256xf32>
    %cst_10 = arith.constant 2.000000e-01 : f32
    %16 = vector.broadcast %cst_10 : f32 to vector<16x256xf32>
    %17 = arith.mulf %16, %15 : vector<16x256xf32>
    %18 = arith.maximumf %15, %17 : vector<16x256xf32>
    %19 = arith.truncf %18 : vector<16x256xf32> to vector<16x256xbf16>
    %c0_11 = arith.constant 0 : index
    %c0_12 = arith.constant 0 : index
    %20 = vector.load %arg6[%c0_11, %c0_12] : memref<256x512xbf16, #tpu.memory_space<vmem>>, vector<256x512xbf16>
    %cst_13 = arith.constant dense<0.000000e+00> : vector<16x512xf32>
    %21 = tpu.matmul %19, %20, %cst_13 {dimension_numbers = #tpu.dot_dimension_numbers<[1], [0], [0], [1], [0, 0, 1, 1], [], []>} : vector<16x256xbf16>, vector<256x512xbf16>, vector<16x512xf32> -> vector<16x512xf32>
    %c0_14 = arith.constant 0 : index
    %c0_15 = arith.constant 0 : index
    %22 = vector.load %arg7[%c0_14, %c0_15] : memref<1x512xf32, #tpu.memory_space<vmem>>, vector<1x512xf32>
    %23 = vector.broadcast %22 : vector<1x512xf32> to vector<16x512xf32>
    %24 = arith.addf %21, %23 : vector<16x512xf32>
    %cst_16 = arith.constant 2.000000e-01 : f32
    %25 = vector.broadcast %cst_16 : f32 to vector<16x512xf32>
    %26 = arith.mulf %25, %24 : vector<16x512xf32>
    %27 = arith.maximumf %24, %26 : vector<16x512xf32>
    %28 = arith.truncf %27 : vector<16x512xf32> to vector<16x512xbf16>
    %c0_17 = arith.constant 0 : index
    %c0_18 = arith.constant 0 : index
    %29 = vector.load %arg8[%c0_17, %c0_18] : memref<512x1024xbf16, #tpu.memory_space<vmem>>, vector<512x1024xbf16>
    %cst_19 = arith.constant dense<0.000000e+00> : vector<16x1024xf32>
    %30 = tpu.matmul %28, %29, %cst_19 {dimension_numbers = #tpu.dot_dimension_numbers<[1], [0], [0], [1], [0, 0, 1, 1], [], []>} : vector<16x512xbf16>, vector<512x1024xbf16>, vector<16x1024xf32> -> vector<16x1024xf32>
    %c0_20 = arith.constant 0 : index
    %c0_21 = arith.constant 0 : index
    %31 = vector.load %arg9[%c0_20, %c0_21] : memref<1x1024xf32, #tpu.memory_space<vmem>>, vector<1x1024xf32>
    %32 = vector.broadcast %31 : vector<1x1024xf32> to vector<16x1024xf32>
    %33 = arith.addf %30, %32 : vector<16x1024xf32>
    %cst_22 = arith.constant 2.000000e-01 : f32
    %34 = vector.broadcast %cst_22 : f32 to vector<16x1024xf32>
    %35 = arith.mulf %34, %33 : vector<16x1024xf32>
    %36 = arith.maximumf %33, %35 : vector<16x1024xf32>
    %37 = arith.truncf %36 : vector<16x1024xf32> to vector<16x1024xbf16>
    %c0_23 = arith.constant 0 : index
    %c0_24 = arith.constant 0 : index
    %38 = vector.load %arg10[%c0_23, %c0_24] : memref<1024x128xbf16, #tpu.memory_space<vmem>>, vector<1024x128xbf16>
    %cst_25 = arith.constant dense<0.000000e+00> : vector<16x128xf32>
    %39 = tpu.matmul %37, %38, %cst_25 {dimension_numbers = #tpu.dot_dimension_numbers<[1], [0], [0], [1], [0, 0, 1, 1], [], []>} : vector<16x1024xbf16>, vector<1024x128xbf16>, vector<16x128xf32> -> vector<16x128xf32>
    %c0_26 = arith.constant 0 : index
    %c0_27 = arith.constant 0 : index
    %40 = vector.load %arg11[%c0_26, %c0_27] : memref<1x128xf32, #tpu.memory_space<vmem>>, vector<1x128xf32>
    %41 = vector.broadcast %40 : vector<1x128xf32> to vector<16x128xf32>
    %42 = arith.addf %39, %41 : vector<16x128xf32>
    %43 = math.tanh %42 : vector<16x128xf32>
    %44 = arith.truncf %43 : vector<16x128xf32> to vector<16x128xbf16>
    %c0_28 = arith.constant 0 : index
    %c0_29 = arith.constant 0 : index
    %45 = vector.load %arg12[%c0_28, %c0_29] : memref<16x128xbf16, #tpu.memory_space<vmem>>, vector<16x128xbf16>
    tpu.vector_store %arg12[%c0_28, %c0_29], %44 {strides = array<i32>} : memref<16x128xbf16, #tpu.memory_space<vmem>>, vector<16x128xbf16>,
    return
  }
  func.func @transform_0(%arg0: i32) -> (i32, i32) {
    %c0_i32 = arith.constant 0 : i32
    %c0_i32_0 = arith.constant 0 : i32
    return %arg0, %c0_i32 : i32, i32
  }
  func.func @transform_1(%arg0: i32) -> (i32, i32) {
    %c0_i32 = arith.constant 0 : i32
    %c0_i32_0 = arith.constant 0 : i32
    return %arg0, %c0_i32 : i32, i32
  }
  func.func @transform_2(%arg0: i32) -> (i32, i32) {
    %c0_i32 = arith.constant 0 : i32
    %c0_i32_0 = arith.constant 0 : i32
    %c0_i32_1 = arith.constant 0 : i32
    return %c0_i32, %c0_i32_0 : i32, i32
  }
  func.func @transform_3(%arg0: i32) -> (i32, i32) {
    %c0_i32 = arith.constant 0 : i32
    %c0_i32_0 = arith.constant 0 : i32
    %c0_i32_1 = arith.constant 0 : i32
    return %c0_i32, %c0_i32_0 : i32, i32
  }
  func.func @transform_4(%arg0: i32) -> (i32, i32) {
    %c0_i32 = arith.constant 0 : i32
    %c0_i32_0 = arith.constant 0 : i32
    %c0_i32_1 = arith.constant 0 : i32
    return %c0_i32, %c0_i32_0 : i32, i32
  }
  func.func @transform_5(%arg0: i32) -> (i32, i32) {
    %c0_i32 = arith.constant 0 : i32
    %c0_i32_0 = arith.constant 0 : i32
    %c0_i32_1 = arith.constant 0 : i32
    return %c0_i32, %c0_i32_0 : i32, i32
  }
  func.func @transform_6(%arg0: i32) -> (i32, i32) {
    %c0_i32 = arith.constant 0 : i32
    %c0_i32_0 = arith.constant 0 : i32
    %c0_i32_1 = arith.constant 0 : i32
    return %c0_i32, %c0_i32_0 : i32, i32
  }
  func.func @transform_7(%arg0: i32) -> (i32, i32) {
    %c0_i32 = arith.constant 0 : i32
    %c0_i32_0 = arith.constant 0 : i32
    %c0_i32_1 = arith.constant 0 : i32
    return %c0_i32, %c0_i32_0 : i32, i32
  }
  func.func @transform_8(%arg0: i32) -> (i32, i32) {
    %c0_i32 = arith.constant 0 : i32
    %c0_i32_0 = arith.constant 0 : i32
    %c0_i32_1 = arith.constant 0 : i32
    return %c0_i32, %c0_i32_0 : i32, i32
  }
  func.func @transform_9(%arg0: i32) -> (i32, i32) {
    %c0_i32 = arith.constant 0 : i32
    %c0_i32_0 = arith.constant 0 : i32
    %c0_i32_1 = arith.constant 0 : i32
    return %c0_i32, %c0_i32_0 : i32, i32
  }
  func.func @transform_10(%arg0: i32) -> (i32, i32) {
    %c0_i32 = arith.constant 0 : i32
    %c0_i32_0 = arith.constant 0 : i32
    %c0_i32_1 = arith.constant 0 : i32
    return %c0_i32, %c0_i32_0 : i32, i32
  }
  func.func @transform_11(%arg0: i32) -> (i32, i32) {
    %c0_i32 = arith.constant 0 : i32
    %c0_i32_0 = arith.constant 0 : i32
    return %arg0, %c0_i32 : i32, i32
  }
}

</mosaic_0001>

<bundles_post_ra>
// kernel: tpu_custom_call.1
= control target key start
LH: loop header
LB: loop body
LE: loop exit
PB: predicated region body
PF: predicated region fallthrough
CT: control target
= control target key end

     0   :  { %16 = vsyncpa [#allocation3], 0  ;;  %s4814_s0 = inlined_call_operand.hbm [shape: bf16[16,32], index: 0, kind: input, shape index: {}]   ;;  %s4815_s1 = inlined_call_operand.vmem [shape: s32[16,1], index: 1, kind: input, shape index: {}]   ;;  %s4816_s2 = inlined_call_operand.hbm [shape: bf16[128,256], index: 2, kind: input, shape index: {}]   ;;  %s4817_s3 = inlined_call_operand.hbm [shape: f32[1,256], index: 3, kind: input, shape index: {}]   ;;  %s4818_s4 = inlined_call_operand.vmem [shape: bf16[32,256], index: 4, kind: input, shape index: {}]   ;;  %s4819_s5 = inlined_call_operand.hbm [shape: bf16[256,512], index: 5, kind: input, shape index: {}]   ;;  %s4820_s6 = inlined_call_operand.hbm [shape: f32[1,512], index: 6, kind: input, shape index: {}]   ;;  %s4821_s7 = inlined_call_operand.hbm [shape: bf16[512,1024], index: 7, kind: input, shape index: {}]   ;;  %s4822_s8 = inlined_call_operand.vmem [shape: f32[1,1024], index: 8, kind: input, shape index: {}]   ;;  %s4823_s9 = inlined_call_operand.hbm [shape: bf16[1024,128], index: 9, kind: input, shape index: {}]   ;;  %s4824_s10 = inlined_call_operand.vmem [shape: f32[1,128], index: 10, kind: input, shape index: {}]   ;;  %s4825_s11 = inlined_call_operand.hbm [shape: bf16[16,128], index: 11, kind: output, shape index: {}]  }
   0x1   :  { %17 = vsyncpa [#allocation6], 0 }
   0x2   :  { %18 = vsyncpa [#allocation9], 0 }
   0x3   :  { %19 = vsyncpa [#allocation12], 0 }
   0x4   :  { %20 = vsyncpa [#allocation4], 0  ;;  %s4524_s17 = smov [#allocation5]   ;;  %s4338_s21 = scalar_lea.hbm %s4816_s2, 2048 }
   0x5   :  { %s40_s18 = sshll.u32 %s4524_s17, 4  ;;  %p4339_p0 = scmp.ne.s32.totalorder %s4816_s2, %s4338_s21  ;;  %s41_s18 = int_to_ptr.vmem [resolvable:$true] %s40_s18 }
   0x6   :  { %p4342_p1 = scmp.lt.u32.totalorder %s4338_s21, %s4816_s2 }
   0x8   :  { %p4344_p2 = pnand %p4342_p1, %p4339_p0 }
   0xa   :  { %4347 = shalt.err (!%p4344_p2)
}
   0xb   :  { %s4348_s26 = scalar_lea.vmem %s41_s18, 2048  ;;  %p4353_p4 = scmp.lt.s32.totalorder %s41_s18, %s41_s18 }
   0xc   :  { %p4349_p3 = scmp.ne.s32.totalorder %s41_s18, %s4348_s26  ;;  %p4354_p5 = scmp.lt.s32.totalorder %s4348_s26, %s4348_s26 }
   0xe   :  { %p4355_p6 = por %p4354_p5, %p4353_p4 }
  0x10   :  { %p4356_p7 = pnand %p4355_p6, %p4349_p3 }
  0x12   :  { %4359 = shalt.err (!%p4356_p7)
}
  0x13   :  { %s4525_s27 = smov 128   ;;  %s4526_s28 = smov 8  }
  0x14   :  { %46 = dma.hbm_to_vmem [thread:$0]  %s4816_s2, 2048, %s41_s18, [#allocation6], %s4525_s27, %s4525_s27, %s4526_s28  }
  0x15   :  { %s4527_s12 = smov [#allocation8]   ;;  %s4360_s16 = scalar_lea.hbm %s4819_s5, 8192 }
  0x16   :  { %s64_s13 = sshll.u32 %s4527_s12, 4  ;;  %p4361_p8 = scmp.ne.s32.totalorder %s4819_s5, %s4360_s16  ;;  %s65_s13 = int_to_ptr.vmem [resolvable:$true] %s64_s13 }
  0x17   :  { %p4364_p9 = scmp.lt.u32.totalorder %s4360_s16, %s4819_s5 }
  0x19   :  { %p4366_p10 = pnand %p4364_p9, %p4361_p8 }
  0x1b   :  { %4369 = shalt.err (!%p4366_p10)
}
  0x1c   :  { %s4370_s22 = scalar_lea.vmem %s65_s13, 8192  ;;  %p4375_p12 = scmp.lt.s32.totalorder %s65_s13, %s65_s13 }
  0x1d   :  { %p4371_p11 = scmp.ne.s32.totalorder %s65_s13, %s4370_s22  ;;  %p4376_p13 = scmp.lt.s32.totalorder %s4370_s22, %s4370_s22 }
  0x1f   :  { %p4377_p0 = por %p4376_p13, %p4375_p12 }
  0x21   :  { %p4378_p1 = pnand %p4377_p0, %p4371_p11 }
  0x23   :  { %4381 = shalt.err (!%p4378_p1)
}
  0x24   :  { %s4528_s2 = smov 256   ;;  %s4529_s18 = smov 16  }
  0x25   :  { %70 = dma.hbm_to_vmem [thread:$0]  %s4819_s5, 8192, %s65_s13, [#allocation9], %s4528_s2, %s4528_s2, %s4529_s18  }
  0x26   :  { %s4530_s25 = smov [#allocation11]   ;;  %s4382_s29 = scalar_lea.hbm %s4821_s7, 32768 }
  0x27   :  { %s86_s26 = sshll.u32 %s4530_s25, 4  ;;  %p4383_p2 = scmp.ne.s32.totalorder %s4821_s7, %s4382_s29  ;;  %s87_s26 = int_to_ptr.vmem [resolvable:$true] %s86_s26 }
  0x28   :  { %p4386_p3 = scmp.lt.u32.totalorder %s4382_s29, %s4821_s7 }
  0x2a   :  { %p4388_p4 = pnand %p4386_p3, %p4383_p2 }
  0x2c   :  { %4391 = shalt.err (!%p4388_p4)
}
  0x2d   :  { %s4392_s16 = scalar_lea.vmem %s87_s26, 32768  ;;  %p4397_p6 = scmp.lt.s32.totalorder %s87_s26, %s87_s26 }
  0x2e   :  { %p4393_p5 = scmp.ne.s32.totalorder %s87_s26, %s4392_s16  ;;  %p4398_p7 = scmp.lt.s32.totalorder %s4392_s16, %s4392_s16 }
  0x30   :  { %p4399_p8 = por %p4398_p7, %p4397_p6 }
  0x32   :  { %p4400_p9 = pnand %p4399_p8, %p4393_p5 }
  0x34   :  { %4403 = shalt.err (!%p4400_p9)
}
  0x35   :  { %s4531_s5 = smov 512   ;;  %s4532_s13 = smov 32  }
  0x36   :  { %92 = dma.hbm_to_vmem [thread:$0]  %s4821_s7, 32768, %s87_s26, [#allocation12], %s4531_s5, %s4531_s5, %s4532_s13  }
  0x37   :  { %s4533_s20 = smov [#allocation2]   ;;  %s4404_s18 = scalar_lea.hbm %s4814_s0, 128 }
  0x38   :  { %s26_s21 = sshll.u32 %s4533_s20, 4  ;;  %p4405_p10 = scmp.ne.s32.totalorder %s4814_s0, %s4404_s18  ;;  %s27_s21 = int_to_ptr.vmem [resolvable:$true] %s26_s21 }
  0x39   :  { %p4408_p11 = scmp.lt.u32.totalorder %s4404_s18, %s4814_s0 }
  0x3b   :  { %p4410_p12 = pnand %p4408_p11, %p4405_p10 }
  0x3d   :  { %4413 = shalt.err (!%p4410_p12)
}
  0x3e   :  { %s4414_s28 = scalar_lea.vmem %s27_s21, 128  ;;  %p4419_p0 = scmp.lt.s32.totalorder %s27_s21, %s27_s21 }
  0x3f   :  { %p4415_p13 = scmp.ne.s32.totalorder %s27_s21, %s4414_s28  ;;  %p4420_p1 = scmp.lt.s32.totalorder %s4414_s28, %s4414_s28 }
  0x41   :  { %p4421_p2 = por %p4420_p1, %p4419_p0 }
  0x43   :  { %p4422_p3 = pnand %p4421_p2, %p4415_p13 }
  0x45   :  { %4425 = shalt.err (!%p4422_p3)
}
  0x46   :  { %s4534_s7 = smov 64   ;;  %s4535_s26 = smov 4  }
  0x47   :  { %32 = dma.hbm_to_vmem [thread:$0]  %s4814_s0, 128, %s27_s21, [#allocation3], %s4534_s7, %s4534_s7, %s4535_s26  }
  0x48   :  { %s4536_s12 = smov [#allocation7]   ;;  %s4537_s15 = smov [#allocation10]  }
  0x49   :  { %s53_s14 = sshll.u32 %s4536_s12, 4  ;;  %s77_s16 = sshll.u32 %s4537_s15, 4  ;;  %s54_s14 = int_to_ptr.vmem [resolvable:$true] %s53_s14  ;;  %s78_s16 = int_to_ptr.vmem [resolvable:$true] %s77_s16 }
  0x4a   :  { %s4426_s17 = scalar_lea.hbm %s4817_s3, 32 }
  0x4b   :  { %p4427_p4 = scmp.ne.s32.totalorder %s4817_s3, %s4426_s17  ;;  %p4430_p5 = scmp.lt.u32.totalorder %s4426_s17, %s4817_s3 }
  0x4d   :  { %p4432_p6 = pnand %p4430_p5, %p4427_p4 }
  0x4f   :  { %4435 = shalt.err (!%p4432_p6)
}
  0x50   :  { %s4436_s0 = scalar_lea.vmem %s54_s14, 32  ;;  %p4441_p8 = scmp.lt.s32.totalorder %s54_s14, %s54_s14 }
  0x51   :  { %p4437_p7 = scmp.ne.s32.totalorder %s54_s14, %s4436_s0  ;;  %p4442_p9 = scmp.lt.s32.totalorder %s4436_s0, %s4436_s0 }
  0x53   :  { %p4443_p10 = por %p4442_p9, %p4441_p8 }
  0x55   :  { %p4444_p11 = pnand %p4443_p10, %p4437_p7 }
  0x57   :  { %4447 = shalt.err (!%p4444_p11)
}
  0x58   :  { %56 = dma.hbm_to_vmem [thread:$0]  %s4817_s3, 32, %s54_s14, [#allocation6]  }
  0x59   :  { %s4448_s25 = scalar_lea.hbm %s4820_s6, 64 }
  0x5a   :  { %p4449_p12 = scmp.ne.s32.totalorder %s4820_s6, %s4448_s25  ;;  %p4452_p13 = scmp.lt.u32.totalorder %s4448_s25, %s4820_s6 }
  0x5c   :  { %p4454_p0 = pnand %p4452_p13, %p4449_p12 }
  0x5e   :  { %4457 = shalt.err (!%p4454_p0)
}
  0x5f   :  { %s4458_s12 = scalar_lea.vmem %s78_s16, 64  ;;  %p4463_p2 = scmp.lt.s32.totalorder %s78_s16, %s78_s16 }
  0x60   :  { %p4459_p1 = scmp.ne.s32.totalorder %s78_s16, %s4458_s12  ;;  %p4464_p3 = scmp.lt.s32.totalorder %s4458_s12, %s4458_s12 }
  0x62   :  { %p4465_p4 = por %p4464_p3, %p4463_p2 }
  0x64   :  { %p4466_p5 = pnand %p4465_p4, %p4459_p1 }
  0x66   :  { %4469 = shalt.err (!%p4466_p5)
}
  0x67   :  { %80 = dma.hbm_to_vmem [thread:$0]  %s4820_s6, 64, %s78_s16, [#allocation9]  }
  0x68   :  { %s4538_s15 = smov [#allocation13]   ;;  %s4470_s19 = scalar_lea.hbm %s4823_s9, 8192 }
  0x69   :  { %s100_s5 = sshll.u32 %s4538_s15, 4  ;;  %p4471_p6 = scmp.ne.s32.totalorder %s4823_s9, %s4470_s19  ;;  %s101_s5 = int_to_ptr.vmem [resolvable:$true] %s100_s5 }
  0x6a   :  { %p4474_p7 = scmp.lt.u32.totalorder %s4470_s19, %s4823_s9 }
  0x6c   :  { %p4476_p8 = pnand %p4474_p7, %p4471_p6 }
  0x6e   :  { %4479 = shalt.err (!%p4476_p8)
}
  0x6f   :  { %s4480_s21 = scalar_lea.vmem %s101_s5, 8192  ;;  %p4485_p10 = scmp.lt.s32.totalorder %s101_s5, %s101_s5 }
  0x70   :  { %p4481_p9 = scmp.ne.s32.totalorder %s101_s5, %s4480_s21  ;;  %p4486_p11 = scmp.lt.s32.totalorder %s4480_s21, %s4480_s21 }
  0x72   :  { %p4487_p12 = por %p4486_p11, %p4485_p10 }
  0x74   :  { %p4488_p13 = pnand %p4487_p12, %p4481_p9 }
  0x76   :  { %4491 = shalt.err (!%p4488_p13)
}
  0x77   :  { %106 = dma.hbm_to_vmem [thread:$0]  %s4823_s9, 8192, %s101_s5, [#allocation12], %s4534_s7, %s4534_s7, %s4535_s26  }
  0x78   :  { %4514 = dma.done.wait [#allocation3], 128  }
  0x79   :  { %4515 = vsyncadd [#allocation3], 4294967168 }
  0x7a   :  { %4516 = dma.done.wait [#allocation6], 2080  }
  0x7b   :  { %4517 = vsyncadd [#allocation6], 4294965216 }
  0x7c   :  { %4518 = dma.done.wait [#allocation9], 8256  }
  0x7d   :  { %4519 = vsyncadd [#allocation9], 4294959040 }
  0x7e   :  { %4520 = dma.done.wait [#allocation12], 40960  }
  0x7f   :  { %4521 = vsyncadd [#allocation12], 4294926336  ;;  %v4539_v0 = vmov 0   ;;  %v131_v1 = vld [vmem:[%s4815_s1] sm:$0xff]  ;;  %v132_v2 = vld [vmem:[%s4815_s1 + $0x8] sm:$0xff]  ;;  %v133_v46 = vlaneseq  ;;  %vm318_vm3 = vcmask 261120  }
  0x80   :  { %4142 = vset.pattern.permute.xlu0 %v4539_v0  ;;  %276 = vmatprep.mubr.bf16.mxu0 %v4539_v0  ;;  %v4143_v3 = vld [vmem:[#allocation5 + $0x4] ss:$8 sps:$4 sm:$0xff]   ;;  %v4145_v4 = vld [vmem:[#allocation5] ss:$8 sps:$4 sm:$0xff]   ;;  %v4146_v5 = vld [vmem:[#allocation5 + $0x14] ss:$8 sps:$4 sm:$0xff]  }
  0x81   :  { %136 = vperm.xlu0 %4142, %v131_v1   ;;  %244 = vmatprep.subr.bf16.mxu0 %v4143_v3  ;;  %v4148_v6 = vld [vmem:[#allocation5 + $0x10] ss:$8 sps:$4 sm:$0xff]   ;;  %v4149_v7 = vld [vmem:[#allocation5 + $0x24] ss:$8 sps:$4 sm:$0xff]   ;;  %v4151_v8 = vld [vmem:[#allocation5 + $0x20] ss:$8 sps:$4 sm:$0xff]  }
  0x82   :  { %245 = vmatpush1.bf16.msra.mxu0 %v4145_v4  ;;  %v4152_v9 = vld [vmem:[#allocation5 + $0x34] ss:$8 sps:$4 sm:$0xff]   ;;  %v4154_v10 = vld [vmem:[#allocation5 + $0x30] ss:$8 sps:$4 sm:$0xff]   ;;  %v4155_v11 = vld [vmem:[#allocation5 + $0x44] ss:$8 sps:$4 sm:$0xff]  }
  0x83   :  { %246 = vmatprep.subr.bf16.mxu0 %v4146_v5  ;;  %v4157_v12 = vld [vmem:[#allocation5 + $0x40] ss:$8 sps:$4 sm:$0xff]   ;;  %v4158_v13 = vld [vmem:[#allocation5 + $0x54] ss:$8 sps:$4 sm:$0xff]   ;;  %v4160_v15 = vld [vmem:[#allocation5 + $0x50] ss:$8 sps:$4 sm:$0xff]  }
  0x84   :  { %v4174_v14 = vld [vmem:[#allocation8 + $0x4] ss:$16 sps:$4 sm:$0xff]   ;;  %v4179_v16 = vld [vmem:[#allocation8] ss:$16 sps:$4 sm:$0xff]   ;;  %v134_v48 = vand.u32 127, %v133_v46 }
  0x85   :  { %139 = vperm.xlu0 %4142, %v132_v2   ;;  %v4180_v17 = vld [vmem:[#allocation8 + $0x24] ss:$16 sps:$4 sm:$0xff]   ;;  %797 = vmatprep.subr.bf16.mxu1 %v4174_v14  ;;  %v4185_v19 = vld [vmem:[#allocation8 + $0x20] ss:$16 sps:$4 sm:$0xff]   ;;  %v4540_v52 = vmov 1.0|1.0  }
  0x86   :  { %247 = vmatpush1.bf16.msra.mxu0 %v4148_v6  ;;  %v4161_v18 = vld [vmem:[#allocation5 + $0x64] ss:$8 sps:$4 sm:$0xff]   ;;  %798 = vmatpush1.bf16.msra.mxu1 %v4179_v16  ;;  %v4163_v20 = vld [vmem:[#allocation5 + $0x60] ss:$8 sps:$4 sm:$0xff]   ;;  %v4164_v21 = vld [vmem:[#allocation5 + $0x74] ss:$8 sps:$4 sm:$0xff]  }
  0x87   :  { %248 = vmatprep.subr.bf16.mxu0 %v4149_v7  ;;  %799 = vmatprep.subr.bf16.mxu1 %v4180_v17  ;;  %v4186_v22 = vld [vmem:[#allocation8 + $0x44] ss:$16 sps:$4 sm:$0xff]   ;;  %v4191_v23 = vld [vmem:[#allocation8 + $0x40] ss:$16 sps:$4 sm:$0xff]   ;;  %v4178_v54 = vld [vmem:[#allocation8 + $0xc] ss:$16 sps:$4 sm:$0xff]  }
  0x88   :  { %v4166_v24 = vld [vmem:[#allocation5 + $0x70] ss:$8 sps:$4 sm:$0xff]   ;;  %v4169_v25 = vld [vmem:[%s4818_s4 + $0x4] ss:$8 sps:$4 sm:$0xff]   ;;  %v4172_v51 = vld [vmem:[%s4818_s4 + $0x14] ss:$8 sps:$4 sm:$0xff]  }
  0x89   :  { %v4192_v26 = vld [vmem:[#allocation8 + $0x64] ss:$16 sps:$4 sm:$0xff]   ;;  %v4197_v27 = vld [vmem:[#allocation8 + $0x60] ss:$16 sps:$4 sm:$0xff]   ;;  %v4176_v56 = vld [vmem:[#allocation8 + $0x8] ss:$16 sps:$4 sm:$0xff]  }
  0x8a   :  { %249 = vmatpush1.bf16.msra.mxu0 %v4151_v8  ;;  %800 = vmatpush1.bf16.msra.mxu1 %v4185_v19  ;;  %v4198_v28 = vld [vmem:[#allocation8 + $0x84] ss:$16 sps:$4 sm:$0xff]   ;;  %v4203_v29 = vld [vmem:[#allocation8 + $0x80] ss:$16 sps:$4 sm:$0xff]   ;;  %v4184_v57 = vld [vmem:[#allocation8 + $0x2c] ss:$16 sps:$4 sm:$0xff]  }
  0x8b   :  { %250 = vmatprep.subr.bf16.mxu0 %v4152_v9  ;;  %801 = vmatprep.subr.bf16.mxu1 %v4186_v22  ;;  %v4204_v30 = vld [vmem:[#allocation8 + $0xa4] ss:$16 sps:$4 sm:$0xff]   ;;  %v4209_v31 = vld [vmem:[#allocation8 + $0xa0] ss:$16 sps:$4 sm:$0xff]   ;;  %v4182_v58 = vld [vmem:[#allocation8 + $0x28] ss:$16 sps:$4 sm:$0xff]  }
  0x8c   :  { %v4210_v32 = vld [vmem:[#allocation8 + $0xc4] ss:$16 sps:$4 sm:$0xff]   ;;  %v4215_v33 = vld [vmem:[#allocation8 + $0xc0] ss:$16 sps:$4 sm:$0xff]   ;;  %v4190_v59 = vld [vmem:[#allocation8 + $0x4c] ss:$16 sps:$4 sm:$0xff]  }
  0x8d   :  { %v4216_v34 = vld [vmem:[#allocation8 + $0xe4] ss:$16 sps:$4 sm:$0xff]   ;;  %v4221_v35 = vld [vmem:[#allocation8 + $0xe0] ss:$16 sps:$4 sm:$0xff]   ;;  %v4188_v60 = vld [vmem:[#allocation8 + $0x48] ss:$16 sps:$4 sm:$0xff]  }
  0x8e   :  { %251 = vmatpush1.bf16.msra.mxu0 %v4154_v10  ;;  %802 = vmatpush1.bf16.msra.mxu1 %v4191_v23  ;;  %v4222_v36 = vld [vmem:[#allocation8 + $0x104] ss:$16 sps:$4 sm:$0xff]   ;;  %v4227_v37 = vld [vmem:[#allocation8 + $0x100] ss:$16 sps:$4 sm:$0xff]   ;;  %v4196_v61 = vld [vmem:[#allocation8 + $0x6c] ss:$16 sps:$4 sm:$0xff]  }
  0x8f   :  { %252 = vmatprep.subr.bf16.mxu0 %v4155_v11  ;;  %803 = vmatprep.subr.bf16.mxu1 %v4192_v26  ;;  %v4228_v38 = vld [vmem:[#allocation8 + $0x124] ss:$16 sps:$4 sm:$0xff]   ;;  %v4233_v39 = vld [vmem:[#allocation8 + $0x120] ss:$16 sps:$4 sm:$0xff]   ;;  %v4194_v62 = vld [vmem:[#allocation8 + $0x68] ss:$16 sps:$4 sm:$0xff]  }
  0x90   :  { %v4234_v40 = vld [vmem:[#allocation8 + $0x144] ss:$16 sps:$4 sm:$0xff]   ;;  %v4239_v41 = vld [vmem:[#allocation8 + $0x140] ss:$16 sps:$4 sm:$0xff]   ;;  %v4202_v63 = vld [vmem:[#allocation8 + $0x8c] ss:$16 sps:$4 sm:$0xff]  }
  0x91   :  { %v4240_v42 = vld [vmem:[#allocation8 + $0x164] ss:$16 sps:$4 sm:$0xff]   ;;  %v4245_v43 = vld [vmem:[#allocation8 + $0x160] ss:$16 sps:$4 sm:$0xff]   ;;  %v4208_v1 = vld [vmem:[#allocation8 + $0xac] ss:$16 sps:$4 sm:$0xff]  }
  0x92   :  { %253 = vmatpush1.bf16.msra.mxu0 %v4157_v12  ;;  %804 = vmatpush1.bf16.msra.mxu1 %v4197_v27  ;;  %v4246_v44 = vld [vmem:[#allocation8 + $0x184] ss:$16 sps:$4 sm:$0xff]   ;;  %v4251_v45 = vld [vmem:[#allocation8 + $0x180] ss:$16 sps:$4 sm:$0xff]   ;;  %v4206_v2 = vld [vmem:[#allocation8 + $0xa8] ss:$16 sps:$4 sm:$0xff]  }
  0x93   :  { %254 = vmatprep.subr.bf16.mxu0 %v4158_v13  ;;  %805 = vmatprep.subr.bf16.mxu1 %v4198_v28  ;;  %v4167_v50 = vld [vmem:[%s4818_s4] ss:$8 sps:$4 sm:$0xff]   ;;  %v4170_v53 = vld [vmem:[%s4818_s4 + $0x10] ss:$8 sps:$4 sm:$0xff]  }
  0x94   :  { %v4173_v55 = vld [vmem:[#allocation2] sm:$0xff]   ;;  %v4269_v28 = vld [vmem:[#allocation8 + $0x1e0] ss:$16 sps:$4 sm:$0xff]  }
  0x95   :  { %v4214_v3 = vld [vmem:[#allocation8 + $0xcc] ss:$16 sps:$4 sm:$0xff]   ;;  %v4212_v4 = vld [vmem:[#allocation8 + $0xc8] ss:$16 sps:$4 sm:$0xff]   ;;  %v4252_v17 = vld [vmem:[#allocation8 + $0x1a4] ss:$16 sps:$4 sm:$0xff]  }
  0x96   :  { %255 = vmatpush1.bf16.msra.mxu0 %v4160_v15  ;;  %806 = vmatpush1.bf16.msra.mxu1 %v4203_v29  ;;  %v4220_v5 = vld [vmem:[#allocation8 + $0xec] ss:$16 sps:$4 sm:$0xff]   ;;  %v4218_v6 = vld [vmem:[#allocation8 + $0xe8] ss:$16 sps:$4 sm:$0xff]  }
  0x97   :  { %256 = vmatprep.subr.bf16.mxu0 %v4161_v18  ;;  %807 = vmatprep.subr.bf16.mxu1 %v4204_v30  ;;  %v4226_v7 = vld [vmem:[#allocation8 + $0x10c] ss:$16 sps:$4 sm:$0xff]   ;;  %v4224_v8 = vld [vmem:[#allocation8 + $0x108] ss:$16 sps:$4 sm:$0xff]  }
  0x98   :  { %v4232_v9 = vld [vmem:[#allocation8 + $0x12c] ss:$16 sps:$4 sm:$0xff]   ;;  %v4230_v10 = vld [vmem:[#allocation8 + $0x128] ss:$16 sps:$4 sm:$0xff]  }
  0x99   :  { %v4238_v11 = vld [vmem:[#allocation8 + $0x14c] ss:$16 sps:$4 sm:$0xff]   ;;  %v4236_v12 = vld [vmem:[#allocation8 + $0x148] ss:$16 sps:$4 sm:$0xff]  }
  0x9a   :  { %257 = vmatpush1.bf16.msra.mxu0 %v4163_v20  ;;  %808 = vmatpush1.bf16.msra.mxu1 %v4209_v31  ;;  %v4244_v13 = vld [vmem:[#allocation8 + $0x16c] ss:$16 sps:$4 sm:$0xff]   ;;  %v4242_v14 = vld [vmem:[#allocation8 + $0x168] ss:$16 sps:$4 sm:$0xff]   ;;  %v4257_v20 = vld [vmem:[#allocation8 + $0x1a0] ss:$16 sps:$4 sm:$0xff]  }
  0x9b   :  { %258 = vmatprep.subr.bf16.mxu0 %v4164_v21  ;;  %809 = vmatprep.subr.bf16.mxu1 %v4210_v32  ;;  %v4250_v15 = vld [vmem:[#allocation8 + $0x18c] ss:$16 sps:$4 sm:$0xff]   ;;  %v4248_v16 = vld [vmem:[#allocation8 + $0x188] ss:$16 sps:$4 sm:$0xff]   ;;  %v4258_v21 = vld [vmem:[#allocation8 + $0x1c4] ss:$16 sps:$4 sm:$0xff]  }
  0x9c   :  { %v4256_v18 = vld [vmem:[#allocation8 + $0x1ac] ss:$16 sps:$4 sm:$0xff]   ;;  %v4254_v19 = vld [vmem:[#allocation8 + $0x1a8] ss:$16 sps:$4 sm:$0xff]  }
  0x9d   :  { %v4262_v22 = vld [vmem:[#allocation8 + $0x1cc] ss:$16 sps:$4 sm:$0xff]   ;;  %v4260_v23 = vld [vmem:[#allocation8 + $0x1c8] ss:$16 sps:$4 sm:$0xff]  }
  0x9e   :  { %259 = vmatpush1.bf16.msra.mxu0 %v4166_v24  ;;  %810 = vmatpush1.bf16.msra.mxu1 %v4215_v33  ;;  %v4263_v24 = vld [vmem:[#allocation8 + $0x1c0] ss:$16 sps:$4 sm:$0xff]   ;;  %v4268_v26 = vld [vmem:[#allocation8 + $0x1ec] ss:$16 sps:$4 sm:$0xff]   ;;  %v4266_v27 = vld [vmem:[#allocation8 + $0x1e8] ss:$16 sps:$4 sm:$0xff]  }
  0x9f   :  { %322 = vmatprep.subr.bf16.mxu0 %v4169_v25  ;;  %811 = vmatprep.subr.bf16.mxu1 %v4216_v34  ;;  %v4264_v25 = vld [vmem:[#allocation8 + $0x1e4] ss:$16 sps:$4 sm:$0xff]   ;;  %v904_v31 = vld [vmem:[#allocation11 + $0x8] sm:$0xff] }
  0xa0   :  { %v903_v29 = vld [vmem:[#allocation11] sm:$0xff]  ;;  %v908_v34 = vld [vmem:[#allocation11 + $0x28] sm:$0xff] }
  0xa1   :  { %v907_v30 = vld [vmem:[#allocation11 + $0x20] sm:$0xff] }
  0xa2   :  { %812 = vmatpush1.bf16.msra.mxu1 %v4221_v35  ;;  %v3670_v32 = vcombine.low %v903_v29, %v907_v30  ;;  %v3671_v33 = vcombine.high %v903_v29, %v907_v30  ;;  %v3672_v35 = vcombine.low %v904_v31, %v908_v34  ;;  %v944_v29 = vld [vmem:[#allocation11 + $0x148] sm:$0xff] }
  0xa3   :  { %813 = vmatprep.subr.bf16.mxu1 %v4222_v36  ;;  %v3673_v36 = vcombine.high %v904_v31, %v908_v34  ;;  %v948_v30 = vld [vmem:[#allocation11 + $0x168] sm:$0xff] }
  0xa4   :  { %v3713_v34 = vcombine.high %v944_v29, %v948_v30 }
  0xa6   :  { %814 = vmatpush1.bf16.msra.mxu1 %v4227_v37  ;;  %v4715_v37 = vshrl.u32 %v133_v46, 7 }
  0xa7   :  { %815 = vmatprep.subr.bf16.mxu1 %v4228_v38 }
  0xa8   :  { %v4718_v38 = vsub.s32 0, %v4715_v37 }
  0xaa   :  { %816 = vmatpush1.bf16.msra.mxu1 %v4233_v39  ;;  %v365_v39 = vld [vmem:[#allocation7] sm:$0x3] }
  0xab   :  { %817 = vmatprep.subr.bf16.mxu1 %v4234_v40  ;;  %v4721_v40 = vsub.s32 1, %v4715_v37 }
  0xae   :  { %818 = vmatpush1.bf16.msra.mxu1 %v4239_v41  ;;  %v370_v41 = vrot.slane %v365_v39, %v4718_v38 }
  0xaf   :  { %819 = vmatprep.subr.bf16.mxu1 %v4240_v42  ;;  %v374_v42 = vrot.slane %v365_v39, %v4721_v40  ;;  %v952_v39 = vld [vmem:[#allocation11 + $0x188] sm:$0xff] }
  0xb2   :  { %820 = vmatpush1.bf16.msra.mxu1 %v4245_v43 }
  0xb3   :  { %821 = vmatprep.subr.bf16.mxu1 %v4246_v44 }
  0xb6   :  { %822 = vmatpush1.bf16.msra.mxu1 %v4251_v45 }
  0xb7   :  { %823 = vmatprep.subr.bf16.mxu1 %v4252_v17 }
  0xba   :  { %824 = vmatpush1.bf16.msra.mxu1 %v4257_v20  ;;  %v939_v20 = vld [vmem:[#allocation11 + $0x120] sm:$0xff] }
  0xbb   :  { %825 = vmatprep.subr.bf16.mxu1 %v4258_v21  ;;  %v936_v21 = vld [vmem:[#allocation11 + $0x108] sm:$0xff] }
  0xbe   :  { %826 = vmatpush1.bf16.msra.mxu1 %v4263_v24 }
  0xbf   :  { %827 = vmatprep.subr.bf16.mxu1 %v4264_v25 }
  0xc2   :  { %828 = vmatpush1.bf16.msra.mxu1 %v4269_v28  ;;  %v947_v28 = vld [vmem:[#allocation11 + $0x160] sm:$0xff] }
  0xc3   :  { %2481 = vmatprep.subr.bf16.mxu1 %v3671_v33 }
 0x100   :  { %v137_v47 = vpop.permute.xlu0 %136 }
 0x101   :  { %vm141_vm0 = vcmp.eq.s32.totalorder %v137_v47, %v134_v48 }
 0x104   :  { %v140_v49 = vpop.permute.xlu0 %139 }
 0x105   :  { %vm142_vm1 = vcmp.eq.s32.totalorder %v140_v49, %v134_v48 }
 0x106   :  { %vm3598_vm2 = vmpackc.low %vm142_vm1, %vm141_vm0 }
 0x107   :  { %3599 = vmatmul.mubr.msk.bf16.vlgmr.msra.gmra.mrb[0].mxu0 %vm3598_vm2, %v4540_v52 }
 0x108   :  { %323 = vmatpush1.bf16.msra.mxu0 %v4167_v50  ;;  %354 = vmatprep.mubr.bf16.mxu0 %v4539_v0  ;;  %v4200_v0 = vld [vmem:[#allocation8 + $0x88] ss:$16 sps:$4 sm:$0xff]  }
 0x109   :  { %324 = vmatprep.subr.bf16.mxu0 %v4172_v51 }
 0x10c   :  { %325 = vmatpush1.bf16.msra.mxu0 %v4170_v53 }
 0x10d   :  { %840 = vmatprep.subr.bf16.mxu0 %v4178_v54 }
 0x113   :  { %3605 = vmatmul.mubr.msk.bf16.vlgmr.msra.gmra.mrb[0].mxu0 %vm318_vm3, %v4173_v55 }
 0x114   :  { %841 = vmatpush1.bf16.msra.mxu0 %v4176_v56 }
 0x115   :  { %842 = vmatprep.subr.bf16.mxu0 %v4184_v57  ;;  %v911_v57 = vld [vmem:[#allocation11 + $0x40] sm:$0xff] }
 0x118   :  { %843 = vmatpush1.bf16.msra.mxu0 %v4182_v58 }
 0x119   :  { %844 = vmatprep.subr.bf16.mxu0 %v4190_v59 }
 0x11c   :  { %845 = vmatpush1.bf16.msra.mxu0 %v4188_v60  ;;  %v915_v60 = vld [vmem:[#allocation11 + $0x60] sm:$0xff] }
 0x11d   :  { %846 = vmatprep.subr.bf16.mxu0 %v4196_v61  ;;  %v912_v61 = vld [vmem:[#allocation11 + $0x48] sm:$0xff] }
 0x120   :  { %847 = vmatpush1.bf16.msra.mxu0 %v4194_v62  ;;  %v916_v62 = vld [vmem:[#allocation11 + $0x68] sm:$0xff] }
 0x121   :  { %848 = vmatprep.subr.bf16.mxu0 %v4202_v63 }
 0x124   :  { %849 = vmatpush1.bf16.msra.mxu0 %v4200_v0 }
 0x125   :  { %850 = vmatprep.subr.bf16.mxu0 %v4208_v1  ;;  %v3679_v1 = vcombine.high %v911_v57, %v915_v60 }
 0x128   :  { %851 = vmatpush1.bf16.msra.mxu0 %v4206_v2  ;;  %v3681_v2 = vcombine.high %v912_v61, %v916_v62 }
 0x129   :  { %852 = vmatprep.subr.bf16.mxu0 %v4214_v3  ;;  %v919_v3 = vld [vmem:[#allocation11 + $0x80] sm:$0xff] }
 0x12c   :  { %853 = vmatpush1.bf16.msra.mxu0 %v4212_v4  ;;  %v923_v4 = vld [vmem:[#allocation11 + $0xa0] sm:$0xff] }
 0x12d   :  { %854 = vmatprep.subr.bf16.mxu0 %v4220_v5  ;;  %v920_v5 = vld [vmem:[#allocation11 + $0x88] sm:$0xff] }
 0x130   :  { %855 = vmatpush1.bf16.msra.mxu0 %v4218_v6  ;;  %v924_v6 = vld [vmem:[#allocation11 + $0xa8] sm:$0xff] }
 0x131   :  { %856 = vmatprep.subr.bf16.mxu0 %v4226_v7  ;;  %v3678_v7 = vcombine.low %v911_v57, %v915_v60  ;;  %v972_v57 = vld [vmem:[#allocation11 + $0x228] sm:$0xff] }
 0x134   :  { %857 = vmatpush1.bf16.msra.mxu0 %v4224_v8  ;;  %v3680_v8 = vcombine.low %v912_v61, %v916_v62  ;;  %v975_v62 = vld [vmem:[#allocation11 + $0x240] sm:$0xff] }
 0x135   :  { %858 = vmatprep.subr.bf16.mxu0 %v4232_v9  ;;  %v3687_v9 = vcombine.high %v919_v3, %v923_v4 }
 0x138   :  { %859 = vmatpush1.bf16.msra.mxu0 %v4230_v10  ;;  %v3689_v10 = vcombine.high %v920_v5, %v924_v6 }
 0x139   :  { %860 = vmatprep.subr.bf16.mxu0 %v4238_v11  ;;  %v927_v11 = vld [vmem:[#allocation11 + $0xc0] sm:$0xff] }
 0x13c   :  { %861 = vmatpush1.bf16.msra.mxu0 %v4236_v12  ;;  %v931_v12 = vld [vmem:[#allocation11 + $0xe0] sm:$0xff] }
 0x13d   :  { %862 = vmatprep.subr.bf16.mxu0 %v4244_v13  ;;  %v928_v13 = vld [vmem:[#allocation11 + $0xc8] sm:$0xff]  ;;  %v3695_v17 = vcombine.high %v927_v11, %v931_v12 }
 0x140   :  { %863 = vmatpush1.bf16.msra.mxu0 %v4242_v14  ;;  %v932_v14 = vld [vmem:[#allocation11 + $0xe8] sm:$0xff] }
 0x141   :  { %864 = vmatprep.subr.bf16.mxu0 %v4250_v15  ;;  %v3686_v15 = vcombine.low %v919_v3, %v923_v4  ;;  %v3696_v24 = vcombine.low %v928_v13, %v932_v14 }
 0x144   :  { %865 = vmatpush1.bf16.msra.mxu0 %v4248_v16  ;;  %v3688_v16 = vcombine.low %v920_v5, %v924_v6  ;;  %v983_v6 = vld [vmem:[#allocation11 + $0x280] sm:$0xff] }
 0x145   :  { %866 = vmatprep.subr.bf16.mxu0 %v4256_v18  ;;  %v3697_v18 = vcombine.high %v928_v13, %v932_v14  ;;  %v991_v14 = vld [vmem:[#allocation11 + $0x2c0] sm:$0xff] }
 0x148   :  { %867 = vmatpush1.bf16.msra.mxu0 %v4254_v19  ;;  %v935_v19 = vld [vmem:[#allocation11 + $0x100] sm:$0xff] }
 0x149   :  { %868 = vmatprep.subr.bf16.mxu0 %v4262_v22  ;;  %v940_v22 = vld [vmem:[#allocation11 + $0x128] sm:$0xff]  ;;  %v3703_v25 = vcombine.high %v935_v19, %v939_v20  ;;  %v3702_v31 = vcombine.low %v935_v19, %v939_v20 }
 0x14c   :  { %869 = vmatpush1.bf16.msra.mxu0 %v4260_v23  ;;  %v3694_v23 = vcombine.low %v927_v11, %v931_v12 }
 0x14d   :  { %870 = vmatprep.subr.bf16.mxu0 %v4268_v26  ;;  %v3705_v26 = vcombine.high %v936_v21, %v940_v22 }
 0x150   :  { %871 = vmatpush1.bf16.msra.mxu0 %v4266_v27  ;;  %v943_v27 = vld [vmem:[#allocation11 + $0x140] sm:$0xff] }
 0x151   :  { %2567 = vmatprep.subr.bf16.mxu0 %v3673_v36  ;;  %v3711_v33 = vcombine.high %v943_v27, %v947_v28  ;;  %v955_v36 = vld [vmem:[#allocation11 + $0x1a0] sm:$0xff] }
 0x1e6   :  { %v356_v43 = vpop.f32.mrb[0].mxu0 }
 0x1e7   :  { %v377_v44 = vadd.f32 %v370_v41, %v356_v43  ;;  %v358_v45 = vpop.f32.mrb[1].mxu0  ;;  %v3712_v43 = vcombine.low %v944_v29, %v948_v30 }
 0x1e8   :  { %v378_v47 = vadd.f32 %v374_v42, %v358_v45  ;;  %v360_v48 = vpop.f32.mrb[2].mxu0 }
 0x1e9   :  { %v381_v49 = vmul.f32 0.2, %v377_v44  ;;  %v379_v50 = vadd.f32 %v370_v41, %v360_v48  ;;  %v362_v46 = vpop.f32.mrb[3].mxu0  ;;  %v956_v41 = vld [vmem:[#allocation11 + $0x1a8] sm:$0xff]  ;;  %v963_v48 = vld [vmem:[#allocation11 + $0x1e0] sm:$0xff] }
 0x1ea   :  { %v382_v51 = vmul.f32 0.2, %v378_v47  ;;  %v380_v52 = vadd.f32 %v374_v42, %v362_v46  ;;  %v3710_v42 = vcombine.low %v943_v27, %v947_v28  ;;  %v3721_v45 = vcombine.high %v952_v39, %v956_v41 }
 0x1eb   :  { %v383_v53 = vmul.f32 0.2, %v379_v50  ;;  %v385_v55 = vmax.f32 %v377_v44, %v381_v49  ;;  %v960_v49 = vld [vmem:[#allocation11 + $0x1c8] sm:$0xff] }
 0x1ec   :  { %v384_v54 = vmul.f32 0.2, %v380_v52  ;;  %v386_v58 = vmax.f32 %v378_v47, %v382_v51  ;;  %v959_v47 = vld [vmem:[#allocation11 + $0x1c0] sm:$0xff]  ;;  %v3720_v51 = vcombine.low %v952_v39, %v956_v41 }
 0x1ed   :  { %v387_v56 = vmax.f32 %v379_v50, %v383_v53  ;;  %v964_v50 = vld [vmem:[#allocation11 + $0x1e8] sm:$0xff] }
 0x1ee   :  { %v388_v59 = vmax.f32 %v380_v52, %v384_v54  ;;  %v3727_v52 = vcombine.high %v959_v47, %v963_v48  ;;  %v3729_v53 = vcombine.high %v960_v49, %v964_v50  ;;  %v967_v54 = vld [vmem:[#allocation11 + $0x200] sm:$0xff] }
 0x1ef   :  { %v389_v63 = vpack.c.bf16 %v387_v56, %v385_v55  ;;  %v971_v55 = vld [vmem:[#allocation11 + $0x220] sm:$0xff]  ;;  %v968_v56 = vld [vmem:[#allocation11 + $0x208] sm:$0xff] }
 0x1f0   :  { %v390_v0 = vpack.c.bf16 %v388_v59, %v386_v58  ;;  %v3726_v58 = vcombine.low %v959_v47, %v963_v48  ;;  %v3728_v59 = vcombine.low %v960_v49, %v964_v50  ;;  %v3735_v60 = vcombine.high %v967_v54, %v971_v55  ;;  %v1020_v48 = vld [vmem:[#allocation11 + $0x3a8] sm:$0xff] }
 0x1f1   :  { %v3737_v61 = vcombine.high %v968_v56, %v972_v57  ;;  %v3736_v3 = vcombine.low %v968_v56, %v972_v57 }
 0x1f2   :  { %829 = vmatprep.mubr.bf16.mxu1 %v390_v0  ;;  %872 = vmatprep.mubr.bf16.mxu0 %v390_v0  ;;  %v976_v0 = vld [vmem:[#allocation11 + $0x248] sm:$0xff] }
 0x1f3   :  { %830 = vmatmul.mubr.bf16.vlgmr.msra.gmra.mrb[0].mxu1 %v389_v63  ;;  %873 = vmatmul.mubr.bf16.vlgmr.msra.gmra.mrb[4].mxu0 %v389_v63  ;;  %v979_v63 = vld [vmem:[#allocation11 + $0x260] sm:$0xff] }
 0x1f4   :  { %2482 = vmatpush1.bf16.msra.mxu1 %v3670_v32  ;;  %2568 = vmatpush1.bf16.msra.mxu0 %v3672_v35  ;;  %v3704_v32 = vcombine.low %v936_v21, %v940_v22  ;;  %v951_v35 = vld [vmem:[#allocation11 + $0x180] sm:$0xff]  ;;  %v3743_v4 = vcombine.high %v975_v62, %v979_v63 }
 0x1f5   :  { %2483 = vmatprep.subr.bf16.mxu1 %v3679_v1  ;;  %2569 = vmatprep.subr.bf16.mxu0 %v3681_v2  ;;  %v3719_v44 = vcombine.high %v951_v35, %v955_v36  ;;  %v3718_v46 = vcombine.low %v951_v35, %v955_v36  ;;  %v980_v1 = vld [vmem:[#allocation11 + $0x268] sm:$0xff]  ;;  %v3734_v2 = vcombine.low %v967_v54, %v971_v55  ;;  %v999_v22 = vld [vmem:[#allocation11 + $0x300] sm:$0xff] }
 0x1f6   :  { %v3745_v5 = vcombine.high %v976_v0, %v980_v1  ;;  %v3744_v11 = vcombine.low %v976_v0, %v980_v1  ;;  %v1012_v36 = vld [vmem:[#allocation11 + $0x368] sm:$0xff] }
 0x1f7   :  { %v1028_v55 = vld [vmem:[#allocation11 + $0x3e8] sm:$0xff] }
 0x1f8   :  { %2484 = vmatpush1.bf16.msra.mxu1 %v3678_v7  ;;  %2570 = vmatpush1.bf16.msra.mxu0 %v3680_v8  ;;  %v987_v7 = vld [vmem:[#allocation11 + $0x2a0] sm:$0xff]  ;;  %v984_v8 = vld [vmem:[#allocation11 + $0x288] sm:$0xff] }
 0x1f9   :  { %2485 = vmatprep.subr.bf16.mxu1 %v3687_v9  ;;  %2571 = vmatprep.subr.bf16.mxu0 %v3689_v10  ;;  %v988_v9 = vld [vmem:[#allocation11 + $0x2a8] sm:$0xff]  ;;  %v3742_v10 = vcombine.low %v975_v62, %v979_v63  ;;  %v3751_v12 = vcombine.high %v983_v6, %v987_v7 }
 0x1fa   :  { %v3753_v13 = vcombine.high %v984_v8, %v988_v9  ;;  %v3752_v19 = vcombine.low %v984_v8, %v988_v9  ;;  %v4733_v63 = vld [vmem:[#allocation11 + $0x428] sm:$0xff] }
 0x1fc   :  { %2486 = vmatpush1.bf16.msra.mxu1 %v3686_v15  ;;  %2572 = vmatpush1.bf16.msra.mxu0 %v3688_v16  ;;  %v995_v15 = vld [vmem:[#allocation11 + $0x2e0] sm:$0xff]  ;;  %v992_v16 = vld [vmem:[#allocation11 + $0x2c8] sm:$0xff] }
 0x1fd   :  { %2487 = vmatprep.subr.bf16.mxu1 %v3695_v17  ;;  %2573 = vmatprep.subr.bf16.mxu0 %v3697_v18  ;;  %v996_v17 = vld [vmem:[#allocation11 + $0x2e8] sm:$0xff]  ;;  %v3750_v18 = vcombine.low %v983_v6, %v987_v7  ;;  %v3759_v20 = vcombine.high %v991_v14, %v995_v15 }
 0x1fe   :  { %v3761_v21 = vcombine.high %v992_v16, %v996_v17  ;;  %v3760_v27 = vcombine.low %v992_v16, %v996_v17 }
 0x200   :  { %2488 = vmatpush1.bf16.msra.mxu1 %v3694_v23  ;;  %2574 = vmatpush1.bf16.msra.mxu0 %v3696_v24  ;;  %v1003_v23 = vld [vmem:[#allocation11 + $0x320] sm:$0xff]  ;;  %v1000_v24 = vld [vmem:[#allocation11 + $0x308] sm:$0xff] }
 0x201   :  { %2489 = vmatprep.subr.bf16.mxu1 %v3703_v25  ;;  %2575 = vmatprep.subr.bf16.mxu0 %v3705_v26  ;;  %v1004_v25 = vld [vmem:[#allocation11 + $0x328] sm:$0xff]  ;;  %v3758_v26 = vcombine.low %v991_v14, %v995_v15  ;;  %v3767_v28 = vcombine.high %v999_v22, %v1003_v23  ;;  %v3766_v30 = vcombine.low %v999_v22, %v1003_v23 }
 0x202   :  { %v3769_v29 = vcombine.high %v1000_v24, %v1004_v25 }
 0x204   :  { %2490 = vmatpush1.bf16.msra.mxu1 %v3702_v31  ;;  %2576 = vmatpush1.bf16.msra.mxu0 %v3704_v32  ;;  %v3768_v31 = vcombine.low %v1000_v24, %v1004_v25  ;;  %v1007_v32 = vld [vmem:[#allocation11 + $0x340] sm:$0xff] }
 0x205   :  { %2491 = vmatprep.subr.bf16.mxu1 %v3711_v33  ;;  %2577 = vmatprep.subr.bf16.mxu0 %v3713_v34  ;;  %v1011_v33 = vld [vmem:[#allocation11 + $0x360] sm:$0xff]  ;;  %v1008_v34 = vld [vmem:[#allocation11 + $0x348] sm:$0xff] }
 0x206   :  { %v3775_v35 = vcombine.high %v1007_v32, %v1011_v33  ;;  %v3774_v39 = vcombine.low %v1007_v32, %v1011_v33  ;;  %v3776_v41 = vcombine.low %v1008_v34, %v1012_v36 }
 0x208   :  { %2492 = vmatpush1.bf16.msra.mxu1 %v3710_v42  ;;  %2578 = vmatpush1.bf16.msra.mxu0 %v3712_v43  ;;  %v3777_v42 = vcombine.high %v1008_v34, %v1012_v36  ;;  %v1015_v43 = vld [vmem:[#allocation11 + $0x380] sm:$0xff] }
 0x209   :  { %2493 = vmatprep.subr.bf16.mxu1 %v3719_v44  ;;  %2579 = vmatprep.subr.bf16.mxu0 %v3721_v45  ;;  %v1019_v44 = vld [vmem:[#allocation11 + $0x3a0] sm:$0xff]  ;;  %v1016_v45 = vld [vmem:[#allocation11 + $0x388] sm:$0xff] }
 0x20a   :  { %v3783_v47 = vcombine.high %v1015_v43, %v1019_v44  ;;  %v3782_v49 = vcombine.low %v1015_v43, %v1019_v44  ;;  %v3784_v50 = vcombine.low %v1016_v45, %v1020_v48 }
 0x20c   :  { %2494 = vmatpush1.bf16.msra.mxu1 %v3718_v46  ;;  %2580 = vmatpush1.bf16.msra.mxu0 %v3720_v51  ;;  %v3785_v46 = vcombine.high %v1016_v45, %v1020_v48  ;;  %v1023_v51 = vld [vmem:[#allocation11 + $0x3c0] sm:$0xff] }
 0x20d   :  { %2495 = vmatprep.subr.bf16.mxu1 %v3727_v52  ;;  %2581 = vmatprep.subr.bf16.mxu0 %v3729_v53  ;;  %v1027_v52 = vld [vmem:[#allocation11 + $0x3e0] sm:$0xff]  ;;  %v1024_v53 = vld [vmem:[#allocation11 + $0x3c8] sm:$0xff] }
 0x20e   :  { %v3791_v54 = vcombine.high %v1023_v51, %v1027_v52  ;;  %v3790_v56 = vcombine.low %v1023_v51, %v1027_v52  ;;  %v3792_v57 = vcombine.low %v1024_v53, %v1028_v55  ;;  %v1039_v45 = vld [vmem:[#allocation11 + $0x440] sm:$0xff] }
 0x210   :  { %2496 = vmatpush1.bf16.msra.mxu1 %v3726_v58  ;;  %2582 = vmatpush1.bf16.msra.mxu0 %v3728_v59  ;;  %v3793_v58 = vcombine.high %v1024_v53, %v1028_v55  ;;  %v4725_v59 = vld [vmem:[#allocation11 + $0x400] sm:$0xff] }
 0x211   :  { %2497 = vmatprep.subr.bf16.mxu1 %v3735_v60  ;;  %2583 = vmatprep.subr.bf16.mxu0 %v3737_v61  ;;  %v4727_v60 = vld [vmem:[#allocation11 + $0x420] sm:$0xff]  ;;  %v4729_v61 = vld [vmem:[#allocation11 + $0x408] sm:$0xff] }
 0x212   :  { %v3799_v62 = vcombine.high %v4725_v59, %v4727_v60  ;;  %v3798_v0 = vcombine.low %v4725_v59, %v4727_v60  ;;  %v3800_v1 = vcombine.low %v4729_v61, %v4733_v63  ;;  %v1047_v53 = vld [vmem:[#allocation11 + $0x480] sm:$0xff] }
 0x214   :  { %2498 = vmatpush1.bf16.msra.mxu1 %v3734_v2  ;;  %2584 = vmatpush1.bf16.msra.mxu0 %v3736_v3  ;;  %v3801_v2 = vcombine.high %v4729_v61, %v4733_v63  ;;  %v467_v3 = vsub.s32 2, %v4715_v37  ;;  %v1055_v63 = vld [vmem:[#allocation11 + $0x4c0] sm:$0xff] }
 0x215   :  { %2499 = vmatprep.subr.bf16.mxu1 %v3743_v4  ;;  %2585 = vmatprep.subr.bf16.mxu0 %v3745_v5  ;;  %v455_v4 = vld [vmem:[#allocation10] sm:$0xf]  ;;  %v471_v5 = vsub.s32 3, %v4715_v37 }
 0x216   :  { %v460_v6 = vrot.slane %v455_v4, %v4718_v38  ;;  %v468_v7 = vrot.slane %v455_v4, %v467_v3  ;;  %v464_v8 = vrot.slane %v455_v4, %v4721_v40 }
 0x217   :  { %v472_v9 = vrot.slane %v455_v4, %v471_v5  ;;  %v1056_v4 = vld [vmem:[#allocation11 + $0x4c8] sm:$0xff] }
 0x218   :  { %2500 = vmatpush1.bf16.msra.mxu1 %v3742_v10  ;;  %2586 = vmatpush1.bf16.msra.mxu0 %v3744_v11 }
 0x219   :  { %2501 = vmatprep.subr.bf16.mxu1 %v3751_v12  ;;  %2587 = vmatprep.subr.bf16.mxu0 %v3753_v13 }
 0x21c   :  { %2502 = vmatpush1.bf16.msra.mxu1 %v3750_v18  ;;  %2588 = vmatpush1.bf16.msra.mxu0 %v3752_v19 }
 0x21d   :  { %2503 = vmatprep.subr.bf16.mxu1 %v3759_v20  ;;  %2589 = vmatprep.subr.bf16.mxu0 %v3761_v21 }
 0x220   :  { %2504 = vmatpush1.bf16.msra.mxu1 %v3758_v26  ;;  %2590 = vmatpush1.bf16.msra.mxu0 %v3760_v27 }
 0x221   :  { %2505 = vmatprep.subr.bf16.mxu1 %v3767_v28  ;;  %2591 = vmatprep.subr.bf16.mxu0 %v3769_v29 }
 0x224   :  { %2506 = vmatpush1.bf16.msra.mxu1 %v3766_v30  ;;  %2592 = vmatpush1.bf16.msra.mxu0 %v3768_v31 }
 0x225   :  { %2507 = vmatprep.subr.bf16.mxu1 %v3775_v35  ;;  %2593 = vmatprep.subr.bf16.mxu0 %v3777_v42 }
 0x228   :  { %2508 = vmatpush1.bf16.msra.mxu1 %v3774_v39  ;;  %2594 = vmatpush1.bf16.msra.mxu0 %v3776_v41 }
 0x229   :  { %2509 = vmatprep.subr.bf16.mxu1 %v3783_v47  ;;  %2595 = vmatprep.subr.bf16.mxu0 %v3785_v46  ;;  %v1044_v46 = vld [vmem:[#allocation11 + $0x468] sm:$0xff] }
 0x22c   :  { %2510 = vmatpush1.bf16.msra.mxu1 %v3782_v49  ;;  %2596 = vmatpush1.bf16.msra.mxu0 %v3784_v50  ;;  %v1043_v49 = vld [vmem:[#allocation11 + $0x460] sm:$0xff]  ;;  %v1040_v50 = vld [vmem:[#allocation11 + $0x448] sm:$0xff] }
 0x22d   :  { %2511 = vmatprep.subr.bf16.mxu1 %v3791_v54  ;;  %2597 = vmatprep.subr.bf16.mxu0 %v3793_v58  ;;  %v3807_v54 = vcombine.high %v1039_v45, %v1043_v49  ;;  %v3809_v55 = vcombine.high %v1040_v50, %v1044_v46  ;;  %v1052_v58 = vld [vmem:[#allocation11 + $0x4a8] sm:$0xff]  ;;  %v3806_v59 = vcombine.low %v1039_v45, %v1043_v49  ;;  %v1099_v45 = vld [vmem:[#allocation11 + $0x620] sm:$0xff] }
 0x22e   :  { %v3808_v60 = vcombine.low %v1040_v50, %v1044_v46  ;;  %v1096_v49 = vld [vmem:[#allocation11 + $0x608] sm:$0xff] }
 0x22f   :  { %v1100_v50 = vld [vmem:[#allocation11 + $0x628] sm:$0xff] }
 0x230   :  { %2512 = vmatpush1.bf16.msra.mxu1 %v3790_v56  ;;  %2598 = vmatpush1.bf16.msra.mxu0 %v3792_v57  ;;  %v1051_v56 = vld [vmem:[#allocation11 + $0x4a0] sm:$0xff]  ;;  %v1048_v57 = vld [vmem:[#allocation11 + $0x488] sm:$0xff] }
 0x231   :  { %2524 = vmatprep.subr.bf16.mxu1 %v3799_v62  ;;  %2610 = vmatprep.subr.bf16.mxu0 %v3801_v2  ;;  %v3815_v61 = vcombine.high %v1047_v53, %v1051_v56  ;;  %v3817_v62 = vcombine.high %v1048_v57, %v1052_v58  ;;  %v1059_v2 = vld [vmem:[#allocation11 + $0x4e0] sm:$0xff] }
 0x2c6   :  { %v831_v10 = vpop.f32.mrb[0].mxu1  ;;  %v874_v11 = vpop.f32.mrb[4].mxu0 }
 0x2c7   :  { %v832_v12 = vadd.f32 %v831_v10, %v460_v6  ;;  %v875_v13 = vadd.f32 %v874_v11, %v468_v7  ;;  %v833_v14 = vpop.f32.mrb[1].mxu1  ;;  %v876_v15 = vpop.f32.mrb[5].mxu0  ;;  %v1067_v10 = vld [vmem:[#allocation11 + $0x520] sm:$0xff]  ;;  %v1064_v11 = vld [vmem:[#allocation11 + $0x508] sm:$0xff] }
 0x2c8   :  { %v834_v16 = vadd.f32 %v833_v14, %v464_v8  ;;  %v877_v17 = vadd.f32 %v876_v15, %v472_v9  ;;  %v835_v18 = vpop.f32.mrb[2].mxu1  ;;  %v878_v19 = vpop.f32.mrb[6].mxu0 }
 0x2c9   :  { %v883_v20 = vmul.f32 0.2, %v832_v12  ;;  %v885_v21 = vmul.f32 0.2, %v875_v13  ;;  %v836_v22 = vadd.f32 %v835_v18, %v460_v6  ;;  %v879_v23 = vadd.f32 %v878_v19, %v468_v7  ;;  %v837_v24 = vpop.f32.mrb[3].mxu1  ;;  %v880_v25 = vpop.f32.mrb[7].mxu0 }
 0x2ca   :  { %v884_v26 = vmul.f32 0.2, %v834_v16  ;;  %v886_v27 = vmul.f32 0.2, %v877_v17  ;;  %v838_v28 = vadd.f32 %v837_v24, %v464_v8  ;;  %v881_v29 = vadd.f32 %v880_v25, %v472_v9  ;;  %v1060_v6 = vld [vmem:[#allocation11 + $0x4e8] sm:$0xff]  ;;  %v1063_v9 = vld [vmem:[#allocation11 + $0x500] sm:$0xff] }
 0x2cb   :  { %v887_v30 = vmul.f32 0.2, %v836_v22  ;;  %v889_v31 = vmul.f32 0.2, %v879_v23  ;;  %v891_v34 = vmax.f32 %v832_v12, %v883_v20  ;;  %v893_v35 = vmax.f32 %v875_v13, %v885_v21  ;;  %v1068_v12 = vld [vmem:[#allocation11 + $0x528] sm:$0xff]  ;;  %v1075_v18 = vld [vmem:[#allocation11 + $0x560] sm:$0xff] }
 0x2cc   :  { %v888_v32 = vmul.f32 0.2, %v838_v28  ;;  %v890_v33 = vmul.f32 0.2, %v881_v29  ;;  %v892_v41 = vmax.f32 %v834_v16, %v884_v26  ;;  %v894_v42 = vmax.f32 %v877_v17, %v886_v27  ;;  %v1071_v17 = vld [vmem:[#allocation11 + $0x540] sm:$0xff]  ;;  %v1072_v19 = vld [vmem:[#allocation11 + $0x548] sm:$0xff] }
 0x2cd   :  { %v895_v36 = vmax.f32 %v836_v22, %v887_v30  ;;  %v897_v39 = vmax.f32 %v879_v23, %v889_v31  ;;  %v3814_v7 = vcombine.low %v1047_v53, %v1051_v56  ;;  %v3816_v8 = vcombine.low %v1048_v57, %v1052_v58  ;;  %v1076_v20 = vld [vmem:[#allocation11 + $0x568] sm:$0xff]  ;;  %v1079_v25 = vld [vmem:[#allocation11 + $0x580] sm:$0xff] }
 0x2ce   :  { %v896_v43 = vmax.f32 %v838_v28, %v888_v32  ;;  %v898_v44 = vmax.f32 %v881_v29, %v890_v33  ;;  %v3822_v13 = vcombine.low %v1055_v63, %v1059_v2  ;;  %v3824_v14 = vcombine.low %v1056_v4, %v1060_v6  ;;  %v1083_v26 = vld [vmem:[#allocation11 + $0x5a0] sm:$0xff]  ;;  %v1080_v27 = vld [vmem:[#allocation11 + $0x588] sm:$0xff] }
 0x2cf   :  { %v4749_v47 = vpack.c.bf16 %v895_v36, %v891_v34  ;;  %v4751_v48 = vpack.c.bf16 %v897_v39, %v893_v35  ;;  %v3831_v15 = vcombine.high %v1063_v9, %v1067_v10  ;;  %v3833_v16 = vcombine.high %v1064_v11, %v1068_v12  ;;  %v1084_v28 = vld [vmem:[#allocation11 + $0x5a8] sm:$0xff]  ;;  %v1087_v33 = vld [vmem:[#allocation11 + $0x5c0] sm:$0xff] }
 0x2d0   :  { %v4753_v51 = vpack.c.bf16 %v896_v43, %v892_v41  ;;  %v4755_v52 = vpack.c.bf16 %v898_v44, %v894_v42  ;;  %v3830_v21 = vcombine.low %v1063_v9, %v1067_v10  ;;  %v3832_v22 = vcombine.low %v1064_v11, %v1068_v12  ;;  %v1091_v34 = vld [vmem:[#allocation11 + $0x5e0] sm:$0xff]  ;;  %v1088_v35 = vld [vmem:[#allocation11 + $0x5c8] sm:$0xff] }
 0x2d1   :  { %v3839_v23 = vcombine.high %v1071_v17, %v1075_v18  ;;  %v3841_v24 = vcombine.high %v1072_v19, %v1076_v20  ;;  %v3838_v29 = vcombine.low %v1071_v17, %v1075_v18  ;;  %v3840_v30 = vcombine.low %v1072_v19, %v1076_v20  ;;  %v1092_v36 = vld [vmem:[#allocation11 + $0x5e8] sm:$0xff]  ;;  %v1095_v44 = vld [vmem:[#allocation11 + $0x600] sm:$0xff] }
 0x2d2   :  { %2513 = vmatprep.mubr.bf16.mxu1 %v4753_v51  ;;  %2599 = vmatprep.mubr.bf16.mxu0 %v4753_v51  ;;  %v3847_v31 = vcombine.high %v1079_v25, %v1083_v26  ;;  %v3849_v32 = vcombine.high %v1080_v27, %v1084_v28  ;;  %v3846_v39 = vcombine.low %v1079_v25, %v1083_v26  ;;  %v1103_v56 = vld [vmem:[#allocation11 + $0x640] sm:$0xff]  ;;  %v1104_v58 = vld [vmem:[#allocation11 + $0x648] sm:$0xff] }
 0x2d3   :  { %2514 = vmatmul.mubr.bf16.vlgmr.msra.gmra.mrb[4].mxu1 %v4749_v47  ;;  %2600 = vmatmul.mubr.bf16.vlgmr.msra.gmra.mrb[8].mxu0 %v4749_v47  ;;  %v3848_v41 = vcombine.low %v1080_v27, %v1084_v28  ;;  %v3855_v42 = vcombine.high %v1087_v33, %v1091_v34  ;;  %v3857_v43 = vcombine.high %v1088_v35, %v1092_v36  ;;  %v1107_v57 = vld [vmem:[#allocation11 + $0x660] sm:$0xff]  ;;  %v1120_v12 = vld [vmem:[#allocation11 + $0x6c8] sm:$0xff] }
 0x2d4   :  { %2525 = vmatpush1.bf16.msra.mxu1 %v3798_v0  ;;  %2611 = vmatpush1.bf16.msra.mxu0 %v3800_v1  ;;  %v3823_v0 = vcombine.high %v1055_v63, %v1059_v2  ;;  %v3825_v1 = vcombine.high %v1056_v4, %v1060_v6  ;;  %v3854_v46 = vcombine.low %v1087_v33, %v1091_v34  ;;  %v1111_v2 = vld [vmem:[#allocation11 + $0x680] sm:$0xff]  ;;  %v1112_v6 = vld [vmem:[#allocation11 + $0x688] sm:$0xff] }
 0x2d5   :  { %2556 = vmatprep.mubr.bf16.mxu1 %v4755_v52  ;;  %2642 = vmatprep.mubr.bf16.mxu0 %v4755_v52  ;;  %v3856_v53 = vcombine.low %v1088_v35, %v1092_v36  ;;  %v1115_v4 = vld [vmem:[#allocation11 + $0x6a0] sm:$0xff]  ;;  %v1128_v20 = vld [vmem:[#allocation11 + $0x708] sm:$0xff] }
 0x2d6   :  { %2526 = vmatprep.subr.bf16.mxu1 %v3807_v54  ;;  %2612 = vmatprep.subr.bf16.mxu0 %v3809_v55  ;;  %v3863_v54 = vcombine.high %v1095_v44, %v1099_v45  ;;  %v3865_v55 = vcombine.high %v1096_v49, %v1100_v50  ;;  %v1119_v10 = vld [vmem:[#allocation11 + $0x6c0] sm:$0xff]  ;;  %v1136_v28 = vld [vmem:[#allocation11 + $0x748] sm:$0xff] }
 0x2d7   :  { %v1123_v11 = vld [vmem:[#allocation11 + $0x6e0] sm:$0xff]  ;;  %v1144_v36 = vld [vmem:[#allocation11 + $0x788] sm:$0xff] }
 0x2d8   :  { %2527 = vmatpush1.bf16.msra.mxu1 %v3806_v59  ;;  %2613 = vmatpush1.bf16.msra.mxu0 %v3808_v60  ;;  %v1108_v59 = vld [vmem:[#allocation11 + $0x668] sm:$0xff]  ;;  %v3862_v60 = vcombine.low %v1095_v44, %v1099_v45  ;;  %v1127_v18 = vld [vmem:[#allocation11 + $0x700] sm:$0xff] }
 0x2d9   :  { %2528 = vmatprep.subr.bf16.mxu1 %v3815_v61  ;;  %2614 = vmatprep.subr.bf16.mxu0 %v3817_v62  ;;  %v3864_v61 = vcombine.low %v1096_v49, %v1100_v50  ;;  %v3871_v62 = vcombine.high %v1103_v56, %v1107_v57  ;;  %v3873_v63 = vcombine.high %v1104_v58, %v1108_v59  ;;  %v1131_v19 = vld [vmem:[#allocation11 + $0x720] sm:$0xff]  ;;  %v1152_v50 = vld [vmem:[#allocation11 + $0x7c8] sm:$0xff] }
 0x2da   :  { %v1135_v26 = vld [vmem:[#allocation11 + $0x740] sm:$0xff] }
 0x2db   :  { %v1139_v27 = vld [vmem:[#allocation11 + $0x760] sm:$0xff] }
 0x2dc   :  { %2529 = vmatpush1.bf16.msra.mxu1 %v3814_v7  ;;  %2615 = vmatpush1.bf16.msra.mxu0 %v3816_v8  ;;  %v1116_v7 = vld [vmem:[#allocation11 + $0x6a8] sm:$0xff]  ;;  %v3870_v8 = vcombine.low %v1103_v56, %v1107_v57  ;;  %v1143_v34 = vld [vmem:[#allocation11 + $0x780] sm:$0xff]  ;;  %v905_v57 = vld [vmem:[#allocation11 + $0x10] sm:$0xff] }
 0x2dd   :  { %2530 = vmatprep.subr.bf16.mxu1 %v3823_v0  ;;  %2616 = vmatprep.subr.bf16.mxu0 %v3825_v1  ;;  %v3872_v0 = vcombine.low %v1104_v58, %v1108_v59  ;;  %v3879_v1 = vcombine.high %v1111_v2, %v1115_v4  ;;  %v3881_v9 = vcombine.high %v1112_v6, %v1116_v7  ;;  %v1147_v35 = vld [vmem:[#allocation11 + $0x7a0] sm:$0xff]  ;;  %v909_v58 = vld [vmem:[#allocation11 + $0x30] sm:$0xff]  ;;  %v906_v59 = vld [vmem:[#allocation11 + $0x18] sm:$0xff] }
 0x2de   :  { %v1151_v45 = vld [vmem:[#allocation11 + $0x7c0] sm:$0xff] }
 0x2df   :  { %v1155_v49 = vld [vmem:[#allocation11 + $0x7e0] sm:$0xff] }
 0x2e0   :  { %2531 = vmatpush1.bf16.msra.mxu1 %v3822_v13  ;;  %2617 = vmatpush1.bf16.msra.mxu0 %v3824_v14  ;;  %v1124_v13 = vld [vmem:[#allocation11 + $0x6e8] sm:$0xff]  ;;  %v3878_v14 = vcombine.low %v1111_v2, %v1115_v4  ;;  %v913_v4 = vld [vmem:[#allocation11 + $0x50] sm:$0xff] }
 0x2e1   :  { %2532 = vmatprep.subr.bf16.mxu1 %v3831_v15  ;;  %2618 = vmatprep.subr.bf16.mxu0 %v3833_v16  ;;  %v3880_v15 = vcombine.low %v1112_v6, %v1116_v7  ;;  %v3887_v16 = vcombine.high %v1119_v10, %v1123_v11  ;;  %v3889_v17 = vcombine.high %v1120_v12, %v1124_v13  ;;  %v917_v6 = vld [vmem:[#allocation11 + $0x70] sm:$0xff]  ;;  %v914_v7 = vld [vmem:[#allocation11 + $0x58] sm:$0xff] }
 0x2e4   :  { %2533 = vmatpush1.bf16.msra.mxu1 %v3830_v21  ;;  %2619 = vmatpush1.bf16.msra.mxu0 %v3832_v22  ;;  %v1132_v21 = vld [vmem:[#allocation11 + $0x728] sm:$0xff]  ;;  %v3886_v22 = vcombine.low %v1119_v10, %v1123_v11  ;;  %v921_v11 = vld [vmem:[#allocation11 + $0x90] sm:$0xff] }
 0x2e5   :  { %2534 = vmatprep.subr.bf16.mxu1 %v3839_v23  ;;  %2620 = vmatprep.subr.bf16.mxu0 %v3841_v24  ;;  %v3888_v23 = vcombine.low %v1120_v12, %v1124_v13  ;;  %v3895_v24 = vcombine.high %v1127_v18, %v1131_v19  ;;  %v3897_v25 = vcombine.high %v1128_v20, %v1132_v21  ;;  %v925_v12 = vld [vmem:[#allocation11 + $0xb0] sm:$0xff]  ;;  %v922_v13 = vld [vmem:[#allocation11 + $0x98] sm:$0xff] }
 0x2e8   :  { %2535 = vmatpush1.bf16.msra.mxu1 %v3838_v29  ;;  %2621 = vmatpush1.bf16.msra.mxu0 %v3840_v30  ;;  %v1140_v29 = vld [vmem:[#allocation11 + $0x768] sm:$0xff]  ;;  %v3894_v30 = vcombine.low %v1127_v18, %v1131_v19  ;;  %v929_v19 = vld [vmem:[#allocation11 + $0xd0] sm:$0xff] }
 0x2e9   :  { %2536 = vmatprep.subr.bf16.mxu1 %v3847_v31  ;;  %2622 = vmatprep.subr.bf16.mxu0 %v3849_v32  ;;  %v3896_v31 = vcombine.low %v1128_v20, %v1132_v21  ;;  %v3903_v32 = vcombine.high %v1135_v26, %v1139_v27  ;;  %v3905_v33 = vcombine.high %v1136_v28, %v1140_v29  ;;  %v933_v20 = vld [vmem:[#allocation11 + $0xf0] sm:$0xff]  ;;  %v930_v21 = vld [vmem:[#allocation11 + $0xd8] sm:$0xff] }
 0x2ec   :  { %2537 = vmatpush1.bf16.msra.mxu1 %v3846_v39  ;;  %2623 = vmatpush1.bf16.msra.mxu0 %v3848_v41  ;;  %v1148_v39 = vld [vmem:[#allocation11 + $0x7a8] sm:$0xff]  ;;  %v3902_v41 = vcombine.low %v1135_v26, %v1139_v27  ;;  %v937_v27 = vld [vmem:[#allocation11 + $0x110] sm:$0xff] }
 0x2ed   :  { %2538 = vmatprep.subr.bf16.mxu1 %v3855_v42  ;;  %2624 = vmatprep.subr.bf16.mxu0 %v3857_v43  ;;  %v3904_v42 = vcombine.low %v1136_v28, %v1140_v29  ;;  %v3911_v43 = vcombine.high %v1143_v34, %v1147_v35  ;;  %v3913_v44 = vcombine.high %v1144_v36, %v1148_v39  ;;  %v941_v28 = vld [vmem:[#allocation11 + $0x130] sm:$0xff]  ;;  %v942_v29 = vld [vmem:[#allocation11 + $0x138] sm:$0xff] }
 0x2f0   :  { %2539 = vmatpush1.bf16.msra.mxu1 %v3854_v46  ;;  %2625 = vmatpush1.bf16.msra.mxu0 %v3856_v53  ;;  %v1156_v46 = vld [vmem:[#allocation11 + $0x7e8] sm:$0xff]  ;;  %v3910_v53 = vcombine.low %v1143_v34, %v1147_v35  ;;  %v945_v34 = vld [vmem:[#allocation11 + $0x150] sm:$0xff] }
 0x2f1   :  { %2540 = vmatprep.subr.bf16.mxu1 %v3863_v54  ;;  %2626 = vmatprep.subr.bf16.mxu0 %v3865_v55  ;;  %v3912_v54 = vcombine.low %v1144_v36, %v1148_v39  ;;  %v3919_v55 = vcombine.high %v1151_v45, %v1155_v49  ;;  %v3921_v56 = vcombine.high %v1152_v50, %v1156_v46  ;;  %v949_v35 = vld [vmem:[#allocation11 + $0x170] sm:$0xff]  ;;  %v946_v36 = vld [vmem:[#allocation11 + $0x158] sm:$0xff] }
 0x2f2   :  { %v950_v39 = vld [vmem:[#allocation11 + $0x178] sm:$0xff] }
 0x2f4   :  { %2541 = vmatpush1.bf16.msra.mxu1 %v3862_v60  ;;  %2627 = vmatpush1.bf16.msra.mxu0 %v3864_v61  ;;  %v910_v60 = vld [vmem:[#allocation11 + $0x38] sm:$0xff]  ;;  %v3918_v61 = vcombine.low %v1151_v45, %v1155_v49  ;;  %v953_v45 = vld [vmem:[#allocation11 + $0x190] sm:$0xff] }
 0x2f5   :  { %2542 = vmatprep.subr.bf16.mxu1 %v3871_v62  ;;  %2628 = vmatprep.subr.bf16.mxu0 %v3873_v63  ;;  %v3920_v62 = vcombine.low %v1152_v50, %v1156_v46  ;;  %v3675_v63 = vcombine.high %v905_v57, %v909_v58  ;;  %v3677_v2 = vcombine.high %v906_v59, %v910_v60  ;;  %v957_v49 = vld [vmem:[#allocation11 + $0x1b0] sm:$0xff]  ;;  %v954_v50 = vld [vmem:[#allocation11 + $0x198] sm:$0xff] }
 0x2f6   :  { %v958_v46 = vld [vmem:[#allocation11 + $0x1b8] sm:$0xff] }
 0x2f8   :  { %2543 = vmatpush1.bf16.msra.mxu1 %v3870_v8  ;;  %2629 = vmatpush1.bf16.msra.mxu0 %v3872_v0  ;;  %v918_v8 = vld [vmem:[#allocation11 + $0x78] sm:$0xff]  ;;  %v3674_v0 = vcombine.low %v905_v57, %v909_v58  ;;  %v961_v57 = vld [vmem:[#allocation11 + $0x1d0] sm:$0xff] }
 0x2f9   :  { %2544 = vmatprep.subr.bf16.mxu1 %v3879_v1  ;;  %2630 = vmatprep.subr.bf16.mxu0 %v3881_v9  ;;  %v3676_v1 = vcombine.low %v906_v59, %v910_v60  ;;  %v3683_v9 = vcombine.high %v913_v4, %v917_v6  ;;  %v3685_v10 = vcombine.high %v914_v7, %v918_v8  ;;  %v965_v58 = vld [vmem:[#allocation11 + $0x1f0] sm:$0xff]  ;;  %v962_v59 = vld [vmem:[#allocation11 + $0x1d8] sm:$0xff] }
 0x2fa   :  { %v966_v60 = vld [vmem:[#allocation11 + $0x1f8] sm:$0xff] }
 0x2fc   :  { %2545 = vmatpush1.bf16.msra.mxu1 %v3878_v14  ;;  %2631 = vmatpush1.bf16.msra.mxu0 %v3880_v15  ;;  %v926_v14 = vld [vmem:[#allocation11 + $0xb8] sm:$0xff]  ;;  %v3682_v15 = vcombine.low %v913_v4, %v917_v6  ;;  %v969_v4 = vld [vmem:[#allocation11 + $0x210] sm:$0xff] }
 0x2fd   :  { %2546 = vmatprep.subr.bf16.mxu1 %v3887_v16  ;;  %2632 = vmatprep.subr.bf16.mxu0 %v3889_v17  ;;  %v3684_v16 = vcombine.low %v914_v7, %v918_v8  ;;  %v3691_v17 = vcombine.high %v921_v11, %v925_v12  ;;  %v3693_v18 = vcombine.high %v922_v13, %v926_v14  ;;  %v973_v6 = vld [vmem:[#allocation11 + $0x230] sm:$0xff]  ;;  %v970_v7 = vld [vmem:[#allocation11 + $0x218] sm:$0xff] }
 0x2fe   :  { %v974_v8 = vld [vmem:[#allocation11 + $0x238] sm:$0xff] }
 0x300   :  { %2547 = vmatpush1.bf16.msra.mxu1 %v3886_v22  ;;  %2633 = vmatpush1.bf16.msra.mxu0 %v3888_v23  ;;  %v934_v22 = vld [vmem:[#allocation11 + $0xf8] sm:$0xff]  ;;  %v3690_v23 = vcombine.low %v921_v11, %v925_v12  ;;  %v977_v11 = vld [vmem:[#allocation11 + $0x250] sm:$0xff] }
 0x301   :  { %2548 = vmatprep.subr.bf16.mxu1 %v3895_v24  ;;  %2634 = vmatprep.subr.bf16.mxu0 %v3897_v25  ;;  %v3692_v24 = vcombine.low %v922_v13, %v926_v14  ;;  %v3699_v25 = vcombine.high %v929_v19, %v933_v20  ;;  %v3701_v26 = vcombine.high %v930_v21, %v934_v22  ;;  %v981_v12 = vld [vmem:[#allocation11 + $0x270] sm:$0xff]  ;;  %v978_v13 = vld [vmem:[#allocation11 + $0x258] sm:$0xff] }
 0x302   :  { %v982_v14 = vld [vmem:[#allocation11 + $0x278] sm:$0xff] }
 0x304   :  { %2549 = vmatpush1.bf16.msra.mxu1 %v3894_v30  ;;  %2635 = vmatpush1.bf16.msra.mxu0 %v3896_v31  ;;  %v3698_v30 = vcombine.low %v929_v19, %v933_v20  ;;  %v3700_v31 = vcombine.low %v930_v21, %v934_v22  ;;  %v985_v19 = vld [vmem:[#allocation11 + $0x290] sm:$0xff]  ;;  %v986_v21 = vld [vmem:[#allocation11 + $0x298] sm:$0xff] }
 0x305   :  { %2550 = vmatprep.subr.bf16.mxu1 %v3903_v32  ;;  %2636 = vmatprep.subr.bf16.mxu0 %v3905_v33  ;;  %v3707_v32 = vcombine.high %v937_v27, %v941_v28  ;;  %v989_v20 = vld [vmem:[#allocation11 + $0x2b0] sm:$0xff]  ;;  %v990_v22 = vld [vmem:[#allocation11 + $0x2b8] sm:$0xff] }
 0x308   :  { %2551 = vmatpush1.bf16.msra.mxu1 %v3902_v41  ;;  %2637 = vmatpush1.bf16.msra.mxu0 %v3904_v42  ;;  %v3706_v41 = vcombine.low %v937_v27, %v941_v28  ;;  %v993_v27 = vld [vmem:[#allocation11 + $0x2d0] sm:$0xff] }
 0x309   :  { %2552 = vmatprep.subr.bf16.mxu1 %v3911_v43  ;;  %2638 = vmatprep.subr.bf16.mxu0 %v3913_v44  ;;  %v3715_v43 = vcombine.high %v945_v34, %v949_v35  ;;  %v3717_v44 = vcombine.high %v946_v36, %v950_v39  ;;  %v997_v28 = vld [vmem:[#allocation11 + $0x2f0] sm:$0xff] }
 0x30c   :  { %2553 = vmatpush1.bf16.msra.mxu1 %v3910_v53  ;;  %2639 = vmatpush1.bf16.msra.mxu0 %v3912_v54  ;;  %v3714_v53 = vcombine.low %v945_v34, %v949_v35  ;;  %v3716_v54 = vcombine.low %v946_v36, %v950_v39  ;;  %v1001_v34 = vld [vmem:[#allocation11 + $0x310] sm:$0xff]  ;;  %v1002_v36 = vld [vmem:[#allocation11 + $0x318] sm:$0xff] }
 0x30d   :  { %2554 = vmatprep.subr.bf16.mxu1 %v3919_v55  ;;  %2640 = vmatprep.subr.bf16.mxu0 %v3921_v56  ;;  %v3723_v55 = vcombine.high %v953_v45, %v957_v49  ;;  %v3725_v56 = vcombine.high %v954_v50, %v958_v46  ;;  %v1005_v35 = vld [vmem:[#allocation11 + $0x330] sm:$0xff]  ;;  %v1006_v39 = vld [vmem:[#allocation11 + $0x338] sm:$0xff] }
 0x310   :  { %2555 = vmatpush1.bf16.msra.mxu1 %v3918_v61  ;;  %2641 = vmatpush1.bf16.msra.mxu0 %v3920_v62  ;;  %v3722_v61 = vcombine.low %v953_v45, %v957_v49  ;;  %v3724_v62 = vcombine.low %v954_v50, %v958_v46  ;;  %v1009_v45 = vld [vmem:[#allocation11 + $0x350] sm:$0xff]  ;;  %v1010_v50 = vld [vmem:[#allocation11 + $0x358] sm:$0xff] }
 0x311   :  { %2653 = vmatprep.subr.bf16.mxu1 %v3675_v63  ;;  %2739 = vmatprep.subr.bf16.mxu0 %v3677_v2  ;;  %v3731_v63 = vcombine.high %v961_v57, %v965_v58  ;;  %v3733_v2 = vcombine.high %v962_v59, %v966_v60  ;;  %v1013_v49 = vld [vmem:[#allocation11 + $0x370] sm:$0xff]  ;;  %v1014_v46 = vld [vmem:[#allocation11 + $0x378] sm:$0xff] }
 0x313   :  { %2557 = vmatmul.mubr.bf16.vlgmr.msra.gmra.mrb[4].mxu1 %v4751_v48  ;;  %2643 = vmatmul.mubr.bf16.vlgmr.msra.gmra.mrb[8].mxu0 %v4751_v48 }
 0x314   :  { %2654 = vmatpush1.bf16.msra.mxu1 %v3674_v0  ;;  %2685 = vmatprep.mubr.bf16.mxu1 %v4753_v51  ;;  %v3730_v0 = vcombine.low %v961_v57, %v965_v58  ;;  %v1017_v57 = vld [vmem:[#allocation11 + $0x390] sm:$0xff] }
 0x315   :  { %2740 = vmatpush1.bf16.msra.mxu0 %v3676_v1  ;;  %2771 = vmatprep.mubr.bf16.mxu0 %v4753_v51  ;;  %v938_v51 = vld [vmem:[#allocation11 + $0x118] sm:$0xff]  ;;  %v3732_v1 = vcombine.low %v962_v59, %v966_v60  ;;  %v1021_v58 = vld [vmem:[#allocation11 + $0x3b0] sm:$0xff] }
 0x316   :  { %2655 = vmatprep.subr.bf16.mxu1 %v3683_v9  ;;  %2741 = vmatprep.subr.bf16.mxu0 %v3685_v10  ;;  %v3709_v33 = vcombine.high %v938_v51, %v942_v29  ;;  %v3708_v42 = vcombine.low %v938_v51, %v942_v29  ;;  %v3739_v9 = vcombine.high %v969_v4, %v973_v6  ;;  %v994_v51 = vld [vmem:[#allocation11 + $0x2d8] sm:$0xff] }
 0x317   :  { %v3741_v10 = vcombine.high %v970_v7, %v974_v8  ;;  %v998_v29 = vld [vmem:[#allocation11 + $0x2f8] sm:$0xff] }
 0x318   :  { %2656 = vmatpush1.bf16.msra.mxu1 %v3682_v15  ;;  %v3738_v15 = vcombine.low %v969_v4, %v973_v6  ;;  %v1018_v59 = vld [vmem:[#allocation11 + $0x398] sm:$0xff]  ;;  %v1025_v4 = vld [vmem:[#allocation11 + $0x3d0] sm:$0xff] }
 0x319   :  { %2742 = vmatpush1.bf16.msra.mxu0 %v3684_v16  ;;  %2657 = vmatprep.subr.bf16.mxu1 %v3691_v17  ;;  %v3740_v16 = vcombine.low %v970_v7, %v974_v8  ;;  %v3747_v17 = vcombine.high %v977_v11, %v981_v12  ;;  %v1022_v60 = vld [vmem:[#allocation11 + $0x3b8] sm:$0xff]  ;;  %v1029_v6 = vld [vmem:[#allocation11 + $0x3f0] sm:$0xff] }
 0x31a   :  { %2743 = vmatprep.subr.bf16.mxu0 %v3693_v18  ;;  %v3749_v18 = vcombine.high %v978_v13, %v982_v14  ;;  %v1026_v7 = vld [vmem:[#allocation11 + $0x3d8] sm:$0xff] }
 0x31b   :  { %v1030_v8 = vld [vmem:[#allocation11 + $0x3f8] sm:$0xff] }
 0x31c   :  { %2658 = vmatpush1.bf16.msra.mxu1 %v3690_v23  ;;  %v3746_v23 = vcombine.low %v977_v11, %v981_v12  ;;  %v1033_v11 = vld [vmem:[#allocation11 + $0x410] sm:$0xff] }
 0x31d   :  { %2744 = vmatpush1.bf16.msra.mxu0 %v3692_v24  ;;  %2659 = vmatprep.subr.bf16.mxu1 %v3699_v25  ;;  %v3748_v24 = vcombine.low %v978_v13, %v982_v14  ;;  %v3755_v25 = vcombine.high %v985_v19, %v989_v20  ;;  %v1037_v12 = vld [vmem:[#allocation11 + $0x430] sm:$0xff]  ;;  %v1034_v13 = vld [vmem:[#allocation11 + $0x418] sm:$0xff] }
 0x31e   :  { %2745 = vmatprep.subr.bf16.mxu0 %v3701_v26  ;;  %v3757_v26 = vcombine.high %v986_v21, %v990_v22  ;;  %v1038_v14 = vld [vmem:[#allocation11 + $0x438] sm:$0xff] }
 0x320   :  { %2660 = vmatpush1.bf16.msra.mxu1 %v3698_v30  ;;  %v3754_v30 = vcombine.low %v985_v19, %v989_v20  ;;  %v1041_v19 = vld [vmem:[#allocation11 + $0x450] sm:$0xff] }
 0x321   :  { %2746 = vmatpush1.bf16.msra.mxu0 %v3700_v31  ;;  %2661 = vmatprep.subr.bf16.mxu1 %v3707_v32  ;;  %v3756_v31 = vcombine.low %v986_v21, %v990_v22  ;;  %v3763_v32 = vcombine.high %v993_v27, %v997_v28  ;;  %v1045_v20 = vld [vmem:[#allocation11 + $0x470] sm:$0xff]  ;;  %v3802_v21 = vcombine.low %v1033_v11, %v1037_v12  ;;  %v1042_v22 = vld [vmem:[#allocation11 + $0x458] sm:$0xff] }
 0x322   :  { %2747 = vmatprep.subr.bf16.mxu0 %v3709_v33  ;;  %v3765_v33 = vcombine.high %v994_v51, %v998_v29 }
 0x324   :  { %2662 = vmatpush1.bf16.msra.mxu1 %v3706_v41  ;;  %v3762_v41 = vcombine.low %v993_v27, %v997_v28  ;;  %v1053_v27 = vld [vmem:[#allocation11 + $0x4b0] sm:$0xff] }
 0x325   :  { %2748 = vmatpush1.bf16.msra.mxu0 %v3708_v42  ;;  %2663 = vmatprep.subr.bf16.mxu1 %v3715_v43  ;;  %v3764_v42 = vcombine.low %v994_v51, %v998_v29  ;;  %v3771_v43 = vcombine.high %v1001_v34, %v1005_v35  ;;  %v1050_v51 = vld [vmem:[#allocation11 + $0x498] sm:$0xff] }
 0x326   :  { %2749 = vmatprep.subr.bf16.mxu0 %v3717_v44  ;;  %v3773_v44 = vcombine.high %v1002_v36, %v1006_v39  ;;  %v1054_v29 = vld [vmem:[#allocation11 + $0x4b8] sm:$0xff] }
 0x328   :  { %2664 = vmatpush1.bf16.msra.mxu1 %v3714_v53  ;;  %v3770_v53 = vcombine.low %v1001_v34, %v1005_v35  ;;  %v1057_v34 = vld [vmem:[#allocation11 + $0x4d0] sm:$0xff] }
 0x329   :  { %2750 = vmatpush1.bf16.msra.mxu0 %v3716_v54  ;;  %2665 = vmatprep.subr.bf16.mxu1 %v3723_v55  ;;  %v3772_v54 = vcombine.low %v1002_v36, %v1006_v39  ;;  %v3779_v55 = vcombine.high %v1009_v45, %v1013_v49  ;;  %v1061_v35 = vld [vmem:[#allocation11 + $0x4f0] sm:$0xff]  ;;  %v1058_v36 = vld [vmem:[#allocation11 + $0x4d8] sm:$0xff] }
 0x32a   :  { %2751 = vmatprep.subr.bf16.mxu0 %v3725_v56  ;;  %v3781_v56 = vcombine.high %v1010_v50, %v1014_v46  ;;  %v1062_v39 = vld [vmem:[#allocation11 + $0x4f8] sm:$0xff] }
 0x32c   :  { %2666 = vmatpush1.bf16.msra.mxu1 %v3722_v61  ;;  %v3778_v61 = vcombine.low %v1009_v45, %v1013_v49  ;;  %v1069_v45 = vld [vmem:[#allocation11 + $0x530] sm:$0xff]  ;;  %v1066_v49 = vld [vmem:[#allocation11 + $0x518] sm:$0xff] }
 0x32d   :  { %2752 = vmatpush1.bf16.msra.mxu0 %v3724_v62  ;;  %2667 = vmatprep.subr.bf16.mxu1 %v3731_v63  ;;  %v3780_v62 = vcombine.low %v1010_v50, %v1014_v46  ;;  %v3787_v63 = vcombine.high %v1017_v57, %v1021_v58  ;;  %v1070_v50 = vld [vmem:[#allocation11 + $0x538] sm:$0xff]  ;;  %v3828_v46 = vcombine.low %v1058_v36, %v1062_v39 }
 0x32e   :  { %2753 = vmatprep.subr.bf16.mxu0 %v3733_v2  ;;  %v3789_v2 = vcombine.high %v1018_v59, %v1022_v60 }
 0x330   :  { %2668 = vmatpush1.bf16.msra.mxu1 %v3730_v0  ;;  %v3786_v0 = vcombine.low %v1017_v57, %v1021_v58  ;;  %v1074_v57 = vld [vmem:[#allocation11 + $0x558] sm:$0xff] }
 0x331   :  { %2754 = vmatpush1.bf16.msra.mxu0 %v3732_v1  ;;  %2669 = vmatprep.subr.bf16.mxu1 %v3739_v9  ;;  %v3788_v1 = vcombine.low %v1018_v59, %v1022_v60  ;;  %v3795_v9 = vcombine.high %v1025_v4, %v1029_v6  ;;  %v1078_v58 = vld [vmem:[#allocation11 + $0x578] sm:$0xff]  ;;  %v3836_v60 = vcombine.low %v1066_v49, %v1070_v50 }
 0x332   :  { %2755 = vmatprep.subr.bf16.mxu0 %v3741_v10  ;;  %v3797_v10 = vcombine.high %v1026_v7, %v1030_v8 }
 0x334   :  { %2670 = vmatpush1.bf16.msra.mxu1 %v3738_v15  ;;  %v3794_v15 = vcombine.low %v1025_v4, %v1029_v6  ;;  %v1082_v4 = vld [vmem:[#allocation11 + $0x598] sm:$0xff] }
 0x335   :  { %2756 = vmatpush1.bf16.msra.mxu0 %v3740_v16  ;;  %2671 = vmatprep.subr.bf16.mxu1 %v3747_v17  ;;  %v3796_v16 = vcombine.low %v1026_v7, %v1030_v8  ;;  %v3803_v17 = vcombine.high %v1033_v11, %v1037_v12  ;;  %v1086_v6 = vld [vmem:[#allocation11 + $0x5b8] sm:$0xff]  ;;  %v3844_v8 = vcombine.low %v1074_v57, %v1078_v58 }
 0x336   :  { %2757 = vmatprep.subr.bf16.mxu0 %v3749_v18  ;;  %v3805_v18 = vcombine.high %v1034_v13, %v1038_v14  ;;  %v1090_v11 = vld [vmem:[#allocation11 + $0x5d8] sm:$0xff] }
 0x337   :  { %v1094_v12 = vld [vmem:[#allocation11 + $0x5f8] sm:$0xff] }
 0x338   :  { %2672 = vmatpush1.bf16.msra.mxu1 %v3746_v23  ;;  %v1046_v23 = vld [vmem:[#allocation11 + $0x478] sm:$0xff] }
 0x339   :  { %2758 = vmatpush1.bf16.msra.mxu0 %v3748_v24  ;;  %2673 = vmatprep.subr.bf16.mxu1 %v3755_v25  ;;  %v3804_v24 = vcombine.low %v1034_v13, %v1038_v14  ;;  %v3811_v25 = vcombine.high %v1041_v19, %v1045_v20  ;;  %v3813_v28 = vcombine.high %v1042_v22, %v1046_v23 }
 0x33a   :  { %2759 = vmatprep.subr.bf16.mxu0 %v3757_v26  ;;  %v1049_v26 = vld [vmem:[#allocation11 + $0x490] sm:$0xff]  ;;  %v3852_v14 = vcombine.low %v1082_v4, %v1086_v6 }
 0x33c   :  { %2674 = vmatpush1.bf16.msra.mxu1 %v3754_v30  ;;  %v3810_v30 = vcombine.low %v1041_v19, %v1045_v20  ;;  %v1098_v19 = vld [vmem:[#allocation11 + $0x618] sm:$0xff] }
 0x33d   :  { %2760 = vmatpush1.bf16.msra.mxu0 %v3756_v31  ;;  %2675 = vmatprep.subr.bf16.mxu1 %v3763_v32  ;;  %v3812_v31 = vcombine.low %v1042_v22, %v1046_v23  ;;  %v3819_v32 = vcombine.high %v1049_v26, %v1053_v27  ;;  %v1102_v20 = vld [vmem:[#allocation11 + $0x638] sm:$0xff]  ;;  %v3860_v22 = vcombine.low %v1090_v11, %v1094_v12 }
 0x33e   :  { %2761 = vmatprep.subr.bf16.mxu0 %v3765_v33  ;;  %v3821_v33 = vcombine.high %v1050_v51, %v1054_v29 }
 0x340   :  { %2676 = vmatpush1.bf16.msra.mxu1 %v3762_v41  ;;  %v3818_v41 = vcombine.low %v1049_v26, %v1053_v27  ;;  %v1109_v26 = vld [vmem:[#allocation11 + $0x670] sm:$0xff]  ;;  %v1106_v27 = vld [vmem:[#allocation11 + $0x658] sm:$0xff] }
 0x341   :  { %2762 = vmatpush1.bf16.msra.mxu0 %v3764_v42  ;;  %2677 = vmatprep.subr.bf16.mxu1 %v3771_v43  ;;  %v3827_v42 = vcombine.high %v1057_v34, %v1061_v35  ;;  %v3829_v43 = vcombine.high %v1058_v36, %v1062_v39 }
 0x342   :  { %2763 = vmatprep.subr.bf16.mxu0 %v3773_v44  ;;  %v1065_v44 = vld [vmem:[#allocation11 + $0x510] sm:$0xff] }
 0x343   :  { %v3834_v59 = vcombine.low %v1065_v44, %v1069_v45 }
 0x344   :  { %2678 = vmatpush1.bf16.msra.mxu1 %v3770_v53  ;;  %v3835_v53 = vcombine.high %v1065_v44, %v1069_v45  ;;  %v1122_v44 = vld [vmem:[#allocation11 + $0x6d8] sm:$0xff] }
 0x345   :  { %2764 = vmatpush1.bf16.msra.mxu0 %v3772_v54  ;;  %2679 = vmatprep.subr.bf16.mxu1 %v3779_v55  ;;  %v3837_v54 = vcombine.high %v1066_v49, %v1070_v50  ;;  %v1073_v55 = vld [vmem:[#allocation11 + $0x550] sm:$0xff]  ;;  %v1126_v45 = vld [vmem:[#allocation11 + $0x6f8] sm:$0xff] }
 0x346   :  { %2765 = vmatprep.subr.bf16.mxu0 %v3781_v56  ;;  %v1077_v56 = vld [vmem:[#allocation11 + $0x570] sm:$0xff] }
 0x347   :  { %v3842_v7 = vcombine.low %v1073_v55, %v1077_v56 }
 0x348   :  { %2680 = vmatpush1.bf16.msra.mxu1 %v3778_v61  ;;  %v3843_v61 = vcombine.high %v1073_v55, %v1077_v56  ;;  %v1130_v55 = vld [vmem:[#allocation11 + $0x718] sm:$0xff] }
 0x349   :  { %2766 = vmatpush1.bf16.msra.mxu0 %v3780_v62  ;;  %2681 = vmatprep.subr.bf16.mxu1 %v3787_v63  ;;  %v3845_v62 = vcombine.high %v1074_v57, %v1078_v58  ;;  %v1081_v63 = vld [vmem:[#allocation11 + $0x590] sm:$0xff]  ;;  %v1134_v56 = vld [vmem:[#allocation11 + $0x738] sm:$0xff]  ;;  %v3892_v58 = vcombine.low %v1122_v44, %v1126_v45 }
 0x34a   :  { %2767 = vmatprep.subr.bf16.mxu0 %v3789_v2  ;;  %v1085_v2 = vld [vmem:[#allocation11 + $0x5b0] sm:$0xff] }
 0x34b   :  { %v3850_v13 = vcombine.low %v1081_v63, %v1085_v2 }
 0x34c   :  { %2682 = vmatpush1.bf16.msra.mxu1 %v3786_v0  ;;  %v3851_v0 = vcombine.high %v1081_v63, %v1085_v2  ;;  %v1138_v63 = vld [vmem:[#allocation11 + $0x758] sm:$0xff] }
 0x34d   :  { %2768 = vmatpush1.bf16.msra.mxu0 %v3788_v1  ;;  %2683 = vmatprep.subr.bf16.mxu1 %v3795_v9  ;;  %v3853_v1 = vcombine.high %v1082_v4, %v1086_v6  ;;  %v1089_v9 = vld [vmem:[#allocation11 + $0x5d0] sm:$0xff]  ;;  %v1142_v2 = vld [vmem:[#allocation11 + $0x778] sm:$0xff]  ;;  %v3900_v6 = vcombine.low %v1130_v55, %v1134_v56 }
 0x34e   :  { %2769 = vmatprep.subr.bf16.mxu0 %v3797_v10  ;;  %v1093_v10 = vld [vmem:[#allocation11 + $0x5f0] sm:$0xff] }
 0x350   :  { %2684 = vmatpush1.bf16.msra.mxu1 %v3794_v15  ;;  %v3859_v15 = vcombine.high %v1089_v9, %v1093_v10 }
 0x351   :  { %2770 = vmatpush1.bf16.msra.mxu0 %v3796_v16  ;;  %2696 = vmatprep.subr.bf16.mxu1 %v3803_v17  ;;  %v3861_v16 = vcombine.high %v1090_v11, %v1094_v12  ;;  %v1097_v17 = vld [vmem:[#allocation11 + $0x610] sm:$0xff]  ;;  %v3908_v12 = vcombine.low %v1138_v63, %v1142_v2 }
 0x352   :  { %2782 = vmatprep.subr.bf16.mxu0 %v3805_v18  ;;  %v1101_v18 = vld [vmem:[#allocation11 + $0x630] sm:$0xff] }
 0x353   :  { %2686 = vmatmul.mubr.bf16.vlgmr.msra.gmra.mrb[8].mxu1 %v4749_v47  ;;  %v3867_v23 = vcombine.high %v1097_v17, %v1101_v18 }
 0x354   :  { %2772 = vmatmul.mubr.bf16.vlgmr.msra.gmra.mrb[12].mxu0 %v4749_v47  ;;  %2697 = vmatpush1.bf16.msra.mxu1 %v3802_v21  ;;  %v3820_v47 = vcombine.low %v1050_v51, %v1054_v29  ;;  %v3858_v21 = vcombine.low %v1089_v9, %v1093_v10  ;;  %v3866_v51 = vcombine.low %v1097_v17, %v1101_v18  ;;  %v1146_v9 = vld [vmem:[#allocation11 + $0x798] sm:$0xff] }
 0x355   :  { %2728 = vmatprep.mubr.bf16.mxu1 %v4755_v52  ;;  %2783 = vmatpush1.bf16.msra.mxu0 %v3804_v24  ;;  %v3869_v24 = vcombine.high %v1098_v19, %v1102_v20  ;;  %v3868_v29 = vcombine.low %v1098_v19, %v1102_v20  ;;  %v1150_v10 = vld [vmem:[#allocation11 + $0x7b8] sm:$0xff] }
 0x356   :  { %2814 = vmatprep.mubr.bf16.mxu0 %v4755_v52  ;;  %2698 = vmatprep.subr.bf16.mxu1 %v3811_v25  ;;  %v3826_v52 = vcombine.low %v1057_v34, %v1061_v35  ;;  %v1105_v25 = vld [vmem:[#allocation11 + $0x650] sm:$0xff]  ;;  %v1114_v34 = vld [vmem:[#allocation11 + $0x698] sm:$0xff]  ;;  %v3916_v20 = vcombine.low %v1146_v9, %v1150_v10 }
 0x357   :  { %2784 = vmatprep.subr.bf16.mxu0 %v3813_v28  ;;  %v1110_v28 = vld [vmem:[#allocation11 + $0x678] sm:$0xff]  ;;  %v3874_v36 = vcombine.low %v1105_v25, %v1109_v26 }
 0x358   :  { %2699 = vmatpush1.bf16.msra.mxu1 %v3810_v30  ;;  %v3875_v30 = vcombine.high %v1105_v25, %v1109_v26  ;;  %v1118_v35 = vld [vmem:[#allocation11 + $0x6b8] sm:$0xff]  ;;  %v3876_v39 = vcombine.low %v1106_v27, %v1110_v28  ;;  %v4270_v25 = vld [vmem:[#allocation13 + $0x40] sm:$0xff]  }
 0x359   :  { %2785 = vmatpush1.bf16.msra.mxu0 %v3812_v31  ;;  %2700 = vmatprep.subr.bf16.mxu1 %v3819_v32  ;;  %v3877_v31 = vcombine.high %v1106_v27, %v1110_v28  ;;  %v1113_v32 = vld [vmem:[#allocation11 + $0x690] sm:$0xff]  ;;  %v3884_v50 = vcombine.low %v1114_v34, %v1118_v35  ;;  %v1154_v17 = vld [vmem:[#allocation11 + $0x7d8] sm:$0xff]  ;;  %v4271_v26 = vld [vmem:[#allocation13] sm:$0xff]  }
 0x35a   :  { %2786 = vmatprep.subr.bf16.mxu0 %v3821_v33  ;;  %v1117_v33 = vld [vmem:[#allocation11 + $0x6b0] sm:$0xff]  ;;  %v1158_v18 = vld [vmem:[#allocation11 + $0x7f8] sm:$0xff]  ;;  %v4272_v27 = vld [vmem:[#allocation13 + $0x48] sm:$0xff]  }
 0x35b   :  { %v3882_v49 = vcombine.low %v1113_v32, %v1117_v33  ;;  %v4302_v28 = vld [vmem:[#allocation13 + $0x140] sm:$0xff]  }
 0x35c   :  { %2701 = vmatpush1.bf16.msra.mxu1 %v3818_v41  ;;  %v3883_v41 = vcombine.high %v1113_v32, %v1117_v33  ;;  %v4308_v32 = vld [vmem:[#allocation13 + $0x108] sm:$0xff]   ;;  %v4275_v33 = vld [vmem:[#allocation13 + $0x10] sm:$0xff]  }
 0x35d   :  { %2787 = vmatpush1.bf16.msra.mxu0 %v3820_v47  ;;  %2702 = vmatprep.subr.bf16.mxu1 %v3827_v42  ;;  %v3885_v47 = vcombine.high %v1114_v34, %v1118_v35  ;;  %v1121_v42 = vld [vmem:[#allocation11 + $0x6d0] sm:$0xff]  ;;  %v4276_v35 = vld [vmem:[#allocation13 + $0x58] sm:$0xff]  }
 0x35e   :  { %2788 = vmatprep.subr.bf16.mxu0 %v3829_v43  ;;  %v1125_v43 = vld [vmem:[#allocation11 + $0x6f0] sm:$0xff] }
 0x35f   :  { %v3890_v57 = vcombine.low %v1121_v42, %v1125_v43  ;;  %v4310_v34 = vld [vmem:[#allocation13 + $0x150] sm:$0xff]  }
 0x360   :  { %2703 = vmatpush1.bf16.msra.mxu1 %v3826_v52  ;;  %v3891_v52 = vcombine.high %v1121_v42, %v1125_v43  ;;  %v4279_v42 = vld [vmem:[#allocation13 + $0x20] sm:$0xff]  }
 0x361   :  { %2789 = vmatpush1.bf16.msra.mxu0 %v3828_v46  ;;  %2704 = vmatprep.subr.bf16.mxu1 %v3835_v53  ;;  %v3893_v46 = vcombine.high %v1122_v44, %v1126_v45  ;;  %v1129_v53 = vld [vmem:[#allocation11 + $0x710] sm:$0xff]  ;;  %v4318_v43 = vld [vmem:[#allocation13 + $0x160] sm:$0xff]   ;;  %v4280_v44 = vld [vmem:[#allocation13 + $0x68] sm:$0xff]  }
 0x362   :  { %2790 = vmatprep.subr.bf16.mxu0 %v3837_v54  ;;  %v1133_v54 = vld [vmem:[#allocation11 + $0x730] sm:$0xff]  ;;  %v4320_v45 = vld [vmem:[#allocation13 + $0x120] sm:$0xff]  }
 0x363   :  { %v3898_v4 = vcombine.low %v1129_v53, %v1133_v54 }
 0x364   :  { %2705 = vmatpush1.bf16.msra.mxu1 %v3834_v59  ;;  %v3899_v59 = vcombine.high %v1129_v53, %v1133_v54  ;;  %v4285_v53 = vld [vmem:[#allocation13 + $0x38] sm:$0xff]   ;;  %v4286_v54 = vld [vmem:[#allocation13 + $0xc0] sm:$0xff]  }
 0x365   :  { %2791 = vmatpush1.bf16.msra.mxu0 %v3836_v60  ;;  %2706 = vmatprep.subr.bf16.mxu1 %v3843_v61  ;;  %v3901_v60 = vcombine.high %v1130_v55, %v1134_v56  ;;  %v1137_v61 = vld [vmem:[#allocation11 + $0x750] sm:$0xff] }
 0x366   :  { %2792 = vmatprep.subr.bf16.mxu0 %v3845_v62  ;;  %v1141_v62 = vld [vmem:[#allocation11 + $0x770] sm:$0xff] }
 0x367   :  { %v3906_v11 = vcombine.low %v1137_v61, %v1141_v62  ;;  %v4776_v55 = vld [vmem:[%s4822_s8] sm:$0xff] }
 0x368   :  { %2707 = vmatpush1.bf16.msra.mxu1 %v3842_v7  ;;  %v3907_v7 = vcombine.high %v1137_v61, %v1141_v62  ;;  %v1164_v56 = vrot.slane %v4776_v55, %v4718_v38 }
 0x369   :  { %2793 = vmatpush1.bf16.msra.mxu0 %v3844_v8  ;;  %2708 = vmatprep.subr.bf16.mxu1 %v3851_v0  ;;  %v3909_v8 = vcombine.high %v1138_v63, %v1142_v2  ;;  %v1145_v0 = vld [vmem:[#allocation11 + $0x790] sm:$0xff] }
 0x36a   :  { %2794 = vmatprep.subr.bf16.mxu0 %v3853_v1  ;;  %v1149_v1 = vld [vmem:[#allocation11 + $0x7b0] sm:$0xff] }
 0x36b   :  { %v3914_v19 = vcombine.low %v1145_v0, %v1149_v1 }
 0x36c   :  { %2709 = vmatpush1.bf16.msra.mxu1 %v3850_v13  ;;  %v3915_v13 = vcombine.high %v1145_v0, %v1149_v1  ;;  %v4324_v1 = vld [vmem:[#allocation13 + $0x128] sm:$0xff]  }
 0x36d   :  { %2795 = vmatpush1.bf16.msra.mxu0 %v3852_v14  ;;  %2710 = vmatprep.subr.bf16.mxu1 %v3859_v15  ;;  %v3917_v14 = vcombine.high %v1146_v9, %v1150_v10  ;;  %v1153_v15 = vld [vmem:[#allocation11 + $0x7d0] sm:$0xff] }
 0x36e   :  { %2796 = vmatprep.subr.bf16.mxu0 %v3861_v16  ;;  %v1157_v16 = vld [vmem:[#allocation11 + $0x7f0] sm:$0xff] }
 0x370   :  { %2711 = vmatpush1.bf16.msra.mxu1 %v3858_v21  ;;  %v3923_v21 = vcombine.high %v1153_v15, %v1157_v16 }
 0x371   :  { %2797 = vmatpush1.bf16.msra.mxu0 %v3860_v22  ;;  %2712 = vmatprep.subr.bf16.mxu1 %v3867_v23  ;;  %v3925_v22 = vcombine.high %v1154_v17, %v1158_v18  ;;  %v3922_v23 = vcombine.low %v1153_v15, %v1157_v16 }
 0x372   :  { %2798 = vmatprep.subr.bf16.mxu0 %v3869_v24  ;;  %v3924_v24 = vcombine.low %v1154_v17, %v1158_v18  ;;  %v4326_v18 = vld [vmem:[#allocation13 + $0x170] sm:$0xff]  }
 0x374   :  { %2713 = vmatpush1.bf16.msra.mxu1 %v3866_v51  ;;  %v4304_v51 = vld [vmem:[#allocation13 + $0x100] sm:$0xff]  }
 0x375   :  { %2799 = vmatpush1.bf16.msra.mxu0 %v3868_v29  ;;  %2714 = vmatprep.subr.bf16.mxu1 %v3875_v30  ;;  %v4273_v29 = vld [vmem:[#allocation13 + $0x8] sm:$0xff]  }
 0x376   :  { %2800 = vmatprep.subr.bf16.mxu0 %v3877_v31  ;;  %v4306_v30 = vld [vmem:[#allocation13 + $0x148] sm:$0xff]   ;;  %v4274_v31 = vld [vmem:[#allocation13 + $0x50] sm:$0xff]  }
 0x378   :  { %2715 = vmatpush1.bf16.msra.mxu1 %v3874_v36  ;;  %v4312_v36 = vld [vmem:[#allocation13 + $0x110] sm:$0xff]  }
 0x379   :  { %2801 = vmatpush1.bf16.msra.mxu0 %v3876_v39  ;;  %2716 = vmatprep.subr.bf16.mxu1 %v3883_v41  ;;  %v4277_v39 = vld [vmem:[#allocation13 + $0x18] sm:$0xff]   ;;  %v4278_v41 = vld [vmem:[#allocation13 + $0x60] sm:$0xff]  }
 0x37a   :  { %2802 = vmatprep.subr.bf16.mxu0 %v3885_v47  ;;  %v4316_v47 = vld [vmem:[#allocation13 + $0x118] sm:$0xff]  }
 0x37c   :  { %2717 = vmatpush1.bf16.msra.mxu1 %v3882_v49  ;;  %v4281_v49 = vld [vmem:[#allocation13 + $0x28] sm:$0xff]  }
 0x37d   :  { %2803 = vmatpush1.bf16.msra.mxu0 %v3884_v50  ;;  %2718 = vmatprep.subr.bf16.mxu1 %v3891_v52  ;;  %v4282_v50 = vld [vmem:[#allocation13 + $0x70] sm:$0xff]  }
 0x37e   :  { %2804 = vmatprep.subr.bf16.mxu0 %v3893_v46  ;;  %v4283_v52 = vld [vmem:[#allocation13 + $0x30] sm:$0xff]   ;;  %v4284_v46 = vld [vmem:[#allocation13 + $0x78] sm:$0xff]  }
 0x380   :  { %2719 = vmatpush1.bf16.msra.mxu1 %v3890_v57  ;;  %v1172_v57 = vrot.slane %v4776_v55, %v467_v3 }
 0x381   :  { %2805 = vmatpush1.bf16.msra.mxu0 %v3892_v58  ;;  %2720 = vmatprep.subr.bf16.mxu1 %v3899_v59  ;;  %v1168_v58 = vrot.slane %v4776_v55, %v4721_v40  ;;  %v1176_v59 = vrot.slane %v4776_v55, %v471_v5 }
 0x382   :  { %2806 = vmatprep.subr.bf16.mxu0 %v3901_v60 }
 0x384   :  { %2721 = vmatpush1.bf16.msra.mxu1 %v3898_v4 }
 0x385   :  { %2807 = vmatpush1.bf16.msra.mxu0 %v3900_v6  ;;  %2722 = vmatprep.subr.bf16.mxu1 %v3907_v7  ;;  %v4322_v6 = vld [vmem:[#allocation13 + $0x168] sm:$0xff]  }
 0x386   :  { %2808 = vmatprep.subr.bf16.mxu0 %v3909_v8 }
 0x388   :  { %2723 = vmatpush1.bf16.msra.mxu1 %v3906_v11 }
 0x389   :  { %2809 = vmatpush1.bf16.msra.mxu0 %v3908_v12  ;;  %2724 = vmatprep.subr.bf16.mxu1 %v3915_v13 }
 0x38a   :  { %2810 = vmatprep.subr.bf16.mxu0 %v3917_v14 }
 0x38c   :  { %2725 = vmatpush1.bf16.msra.mxu1 %v3914_v19 }
 0x38d   :  { %2811 = vmatpush1.bf16.msra.mxu0 %v3916_v20  ;;  %2726 = vmatprep.subr.bf16.mxu1 %v3923_v21  ;;  %v4328_v21 = vld [vmem:[#allocation13 + $0x130] sm:$0xff]  }
 0x38e   :  { %2812 = vmatprep.subr.bf16.mxu0 %v3925_v22 }
 0x390   :  { %2727 = vmatpush1.bf16.msra.mxu1 %v3922_v23 }
 0x391   :  { %2813 = vmatpush1.bf16.msra.mxu0 %v3924_v24  ;;  %4000 = vmatprep.subr.bf16.mxu1 %v4270_v25 }
 0x392   :  { %4044 = vmatprep.subr.bf16.mxu0 %v4302_v28 }
 0x393   :  { %2729 = vmatmul.mubr.bf16.vlgmr.msra.gmra.mrb[8].mxu1 %v4751_v48 }
 0x394   :  { %2815 = vmatmul.mubr.bf16.vlgmr.msra.gmra.mrb[12].mxu0 %v4751_v48  ;;  %4001 = vmatpush3.bf16.msra.mxu1 %v4271_v26  ;;  %v4314_v48 = vld [vmem:[#allocation13 + $0x158] sm:$0xff]  }
 0x395   :  { %4002 = vmatprep.subr.bf16.mxu1 %v4272_v27  ;;  %4045 = vmatpush3.bf16.msra.mxu0 %v4304_v51 }
 0x396   :  { %4046 = vmatprep.subr.bf16.mxu0 %v4306_v30 }
 0x398   :  { %4003 = vmatpush3.bf16.msra.mxu1 %v4273_v29 }
 0x399   :  { %4004 = vmatprep.subr.bf16.mxu1 %v4274_v31  ;;  %4047 = vmatpush3.bf16.msra.mxu0 %v4308_v32  ;;  %v4330_v31 = vld [vmem:[#allocation13 + $0x178] sm:$0xff]  }
 0x39a   :  { %4048 = vmatprep.subr.bf16.mxu0 %v4310_v34 }
 0x39c   :  { %4005 = vmatpush3.bf16.msra.mxu1 %v4275_v33  ;;  %v4287_v33 = vld [vmem:[#allocation13 + $0x80] sm:$0xff]  }
 0x39d   :  { %4006 = vmatprep.subr.bf16.mxu1 %v4276_v35  ;;  %4049 = vmatpush3.bf16.msra.mxu0 %v4312_v36  ;;  %v4332_v35 = vld [vmem:[#allocation13 + $0x138] sm:$0xff]   ;;  %v4288_v36 = vld [vmem:[#allocation13 + $0xc8] sm:$0xff]  }
 0x39e   :  { %4050 = vmatprep.subr.bf16.mxu0 %v4314_v48  ;;  %v4290_v48 = vld [vmem:[#allocation13 + $0xd0] sm:$0xff]  }
 0x3a0   :  { %4007 = vmatpush3.bf16.msra.mxu1 %v4277_v39  ;;  %v4289_v39 = vld [vmem:[#allocation13 + $0x88] sm:$0xff]  }
 0x3a1   :  { %4008 = vmatprep.subr.bf16.mxu1 %v4278_v41  ;;  %4051 = vmatpush3.bf16.msra.mxu0 %v4316_v47  ;;  %v4291_v41 = vld [vmem:[#allocation13 + $0x90] sm:$0xff]   ;;  %v4292_v47 = vld [vmem:[#allocation13 + $0xd8] sm:$0xff]  }
 0x3a2   :  { %4052 = vmatprep.subr.bf16.mxu0 %v4318_v43  ;;  %v4294_v43 = vld [vmem:[#allocation13 + $0xe0] sm:$0xff]  }
 0x3a4   :  { %4009 = vmatpush3.bf16.msra.mxu1 %v4279_v42  ;;  %v4293_v42 = vld [vmem:[#allocation13 + $0x98] sm:$0xff]  }
 0x3a5   :  { %4010 = vmatprep.subr.bf16.mxu1 %v4280_v44  ;;  %4053 = vmatpush3.bf16.msra.mxu0 %v4320_v45  ;;  %v4295_v44 = vld [vmem:[#allocation13 + $0xa0] sm:$0xff]   ;;  %v4296_v45 = vld [vmem:[#allocation13 + $0xe8] sm:$0xff]  }
 0x3a6   :  { %4054 = vmatprep.subr.bf16.mxu0 %v4322_v6  ;;  %v4325_v6 = vld [vmem:[#allocation13 + $0x1a8] sm:$0xff]  }
 0x3a8   :  { %4011 = vmatpush3.bf16.msra.mxu1 %v4281_v49  ;;  %v4297_v49 = vld [vmem:[#allocation13 + $0xa8] sm:$0xff]  }
 0x3a9   :  { %4012 = vmatprep.subr.bf16.mxu1 %v4282_v50  ;;  %4055 = vmatpush3.bf16.msra.mxu0 %v4324_v1  ;;  %v4298_v50 = vld [vmem:[#allocation13 + $0xf0] sm:$0xff]   ;;  %v1179_v1 = vsub.s32 4, %v4715_v37 }
 0x3aa   :  { %4056 = vmatprep.subr.bf16.mxu0 %v4326_v18 }
 0x3ac   :  { %4013 = vmatpush3.bf16.msra.mxu1 %v4283_v52  ;;  %v4299_v52 = vld [vmem:[#allocation13 + $0xb0] sm:$0xff]  }
 0x3ad   :  { %4014 = vmatprep.subr.bf16.mxu1 %v4284_v46  ;;  %4057 = vmatpush3.bf16.msra.mxu0 %v4328_v21  ;;  %v4300_v46 = vld [vmem:[#allocation13 + $0xf8] sm:$0xff]  }
 0x3ae   :  { %4058 = vmatprep.subr.bf16.mxu0 %v4330_v31 }
 0x3b0   :  { %4015 = vmatpush3.bf16.msra.mxu1 %v4285_v53  ;;  %v4301_v53 = vld [vmem:[#allocation13 + $0xb8] sm:$0xff]  }
 0x3b1   :  { %4022 = vmatprep.subr.bf16.mxu1 %v4286_v54  ;;  %4059 = vmatpush3.bf16.msra.mxu0 %v4332_v35  ;;  %v4303_v54 = vld [vmem:[#allocation13 + $0x1c0] sm:$0xff]  }
 0x3e6   :  { %v2558_v60 = vpop.f32.mrb[4].mxu1  ;;  %v2644_v61 = vpop.f32.mrb[8].mxu0 }
 0x3e7   :  { %v4088_v62 = vadd.f32 %v2558_v60, %v1164_v56  ;;  %v4092_v63 = vadd.f32 %v2644_v61, %v1172_v57  ;;  %v2560_v2 = vpop.f32.mrb[5].mxu1  ;;  %v2646_v4 = vpop.f32.mrb[9].mxu0  ;;  %v4313_v60 = vld [vmem:[#allocation13 + $0x190] sm:$0xff]   ;;  %v4315_v61 = vld [vmem:[#allocation13 + $0x1d8] sm:$0xff]  }
 0x3e8   :  { %v4089_v7 = vadd.f32 %v2560_v2, %v1168_v58  ;;  %v4093_v38 = vadd.f32 %v2646_v4, %v1176_v59  ;;  %v2562_v8 = vpop.f32.mrb[6].mxu1  ;;  %v2648_v0 = vpop.f32.mrb[10].mxu0  ;;  %v4321_v2 = vld [vmem:[#allocation13 + $0x1a0] sm:$0xff]   ;;  %v4323_v4 = vld [vmem:[#allocation13 + $0x1e8] sm:$0xff]  }
 0x3e9   :  { %v2825_v3 = vmul.f32 0.2, %v4088_v62  ;;  %v2827_v9 = vmul.f32 0.2, %v4092_v63  ;;  %v4090_v10 = vadd.f32 %v2562_v8, %v1164_v56  ;;  %v4094_v40 = vadd.f32 %v2648_v0, %v1172_v57  ;;  %v2564_v11 = vpop.f32.mrb[7].mxu1  ;;  %v2650_v12 = vpop.f32.mrb[11].mxu0 }
 0x3ea   :  { %v2826_v5 = vmul.f32 0.2, %v4089_v7  ;;  %v2828_v13 = vmul.f32 0.2, %v4093_v38  ;;  %v4091_v14 = vadd.f32 %v2564_v11, %v1168_v58  ;;  %v4095_v15 = vadd.f32 %v2650_v12, %v1176_v59  ;;  %v4305_v56 = vld [vmem:[#allocation13 + $0x180] sm:$0xff]   ;;  %v4307_v57 = vld [vmem:[#allocation13 + $0x1c8] sm:$0xff]  }
 0x3eb   :  { %v2833_v16 = vmul.f32 0.2, %v4090_v10  ;;  %v2835_v17 = vmul.f32 0.2, %v4094_v40  ;;  %v2841_v22 = vmax.f32 %v4088_v62, %v2825_v3  ;;  %v2843_v23 = vmax.f32 %v4092_v63, %v2827_v9  ;;  %v4309_v58 = vld [vmem:[#allocation13 + $0x188] sm:$0xff]   ;;  %v4311_v59 = vld [vmem:[#allocation13 + $0x1d0] sm:$0xff]  }
 0x3ec   :  { %v2834_v19 = vmul.f32 0.2, %v4091_v14  ;;  %v2836_v20 = vmul.f32 0.2, %v4095_v15  ;;  %v2842_v26 = vmax.f32 %v4089_v7, %v2826_v5  ;;  %v2844_v27 = vmax.f32 %v4093_v38, %v2828_v13  ;;  %v4317_v62 = vld [vmem:[#allocation13 + $0x198] sm:$0xff]   ;;  %v4319_v63 = vld [vmem:[#allocation13 + $0x1e0] sm:$0xff]  }
 0x3ed   :  { %v2849_v24 = vmax.f32 %v4090_v10, %v2833_v16  ;;  %v2851_v25 = vmax.f32 %v4094_v40, %v2835_v17  ;;  %v4327_v7 = vld [vmem:[#allocation13 + $0x1f0] sm:$0xff]   ;;  %v4331_v8 = vld [vmem:[#allocation13 + $0x1f8] sm:$0xff]   ;;  %v1187_v3 = vsub.s32 6, %v4715_v37  ;;  %v1183_v9 = vsub.s32 5, %v4715_v37 }
 0x3ee   :  { %v2850_v28 = vmax.f32 %v4091_v14, %v2834_v19  ;;  %v2852_v51 = vmax.f32 %v4095_v15, %v2836_v20  ;;  %v4329_v38 = vld [vmem:[#allocation13 + $0x1b0] sm:$0xff]   ;;  %v4333_v0 = vld [vmem:[#allocation13 + $0x1b8] sm:$0xff]   ;;  %v1191_v10 = vsub.s32 7, %v4715_v37  ;;  %v1180_v40 = vrot.slane %v4776_v55, %v1179_v1 }
 0x3ef   :  { %v2857_v29 = vpack.c.bf16 %v2849_v24, %v2841_v22  ;;  %v2859_v30 = vpack.c.bf16 %v2851_v25, %v2843_v23  ;;  %v1188_v11 = vrot.slane %v4776_v55, %v1187_v3  ;;  %v1184_v12 = vrot.slane %v4776_v55, %v1183_v9 }
 0x3f0   :  { %v2858_v32 = vpack.c.bf16 %v2850_v28, %v2842_v26  ;;  %v2860_v34 = vpack.c.bf16 %v2852_v51, %v2844_v27  ;;  %v1192_v5 = vrot.slane %v4776_v55, %v1191_v10 }
 0x3f2   :  { %3416 = vmatprep.mubr.bf16.mxu1 %v2858_v32 }
 0x3f3   :  { %3417 = vmatmul.mubr.bf16.vlgmr.msra.gmra.mrb[12].mxu1 %v2857_v29 }
 0x3f4   :  { %4023 = vmatpush3.bf16.msra.mxu1 %v4287_v33  ;;  %3457 = vmatprep.mubr.bf16.mxu1 %v2860_v34 }
 0x3f5   :  { %4024 = vmatprep.subr.bf16.mxu1 %v4288_v36 }
 0x3f8   :  { %4025 = vmatpush3.bf16.msra.mxu1 %v4289_v39 }
 0x3f9   :  { %4026 = vmatprep.subr.bf16.mxu1 %v4290_v48 }
 0x3fc   :  { %4027 = vmatpush3.bf16.msra.mxu1 %v4291_v41 }
 0x3fd   :  { %4028 = vmatprep.subr.bf16.mxu1 %v4292_v47 }
 0x400   :  { %4029 = vmatpush3.bf16.msra.mxu1 %v4293_v42 }
 0x401   :  { %4030 = vmatprep.subr.bf16.mxu1 %v4294_v43 }
 0x404   :  { %4031 = vmatpush3.bf16.msra.mxu1 %v4295_v44 }
 0x405   :  { %4032 = vmatprep.subr.bf16.mxu1 %v4296_v45 }
 0x408   :  { %4033 = vmatpush3.bf16.msra.mxu1 %v4297_v49 }
 0x409   :  { %4034 = vmatprep.subr.bf16.mxu1 %v4298_v50 }
 0x40c   :  { %4035 = vmatpush3.bf16.msra.mxu1 %v4299_v52 }
 0x40d   :  { %4036 = vmatprep.subr.bf16.mxu1 %v4300_v46 }
 0x410   :  { %4037 = vmatpush3.bf16.msra.mxu1 %v4301_v53 }
 0x411   :  { %4066 = vmatprep.subr.bf16.mxu1 %v4303_v54 }
 0x413   :  { %3458 = vmatmul.mubr.bf16.vlgmr.msra.gmra.mrb[16].mxu1 %v2859_v30 }
 0x414   :  { %4067 = vmatpush3.bf16.msra.mxu1 %v4305_v56 }
 0x415   :  { %4068 = vmatprep.subr.bf16.mxu1 %v4307_v57  ;;  %v3926_v57 = vld [vmem:[%s4824_s10] ss:$0 sm:$0xff]  ;;  %s4541_s10 = smov [#allocation14]  }
 0x416   :  { %s3565_s5 = sshll.u32 %s4541_s10, 4  ;;  %s3566_s5 = int_to_ptr.vmem [resolvable:$true] %s3565_s5 }
 0x417   :  { %s4492_s13 = scalar_lea.vmem %s3566_s5, 128  ;;  %p4497_p1 = scmp.lt.s32.totalorder %s3566_s5, %s3566_s5 }
 0x418   :  { %4069 = vmatpush3.bf16.msra.mxu1 %v4309_v58  ;;  %p4493_p0 = scmp.ne.s32.totalorder %s3566_s5, %s4492_s13  ;;  %p4498_p2 = scmp.lt.s32.totalorder %s4492_s13, %s4492_s13 }
 0x419   :  { %4070 = vmatprep.subr.bf16.mxu1 %v4311_v59 }
 0x41a   :  { %p4499_p3 = por %p4498_p2, %p4497_p1 }
 0x41c   :  { %4071 = vmatpush3.bf16.msra.mxu1 %v4313_v60  ;;  %p4500_p4 = pnand %p4499_p3, %p4493_p0 }
 0x41d   :  { %4072 = vmatprep.subr.bf16.mxu1 %v4315_v61 }
 0x420   :  { %4073 = vmatpush3.bf16.msra.mxu1 %v4317_v62 }
 0x421   :  { %4074 = vmatprep.subr.bf16.mxu1 %v4319_v63 }
 0x424   :  { %4075 = vmatpush3.bf16.msra.mxu1 %v4321_v2 }
 0x425   :  { %4076 = vmatprep.subr.bf16.mxu1 %v4323_v4 }
 0x428   :  { %4077 = vmatpush3.bf16.msra.mxu1 %v4325_v6 }
 0x429   :  { %4078 = vmatprep.subr.bf16.mxu1 %v4327_v7 }
 0x42c   :  { %4079 = vmatpush3.bf16.msra.mxu1 %v4329_v38 }
 0x42d   :  { %4080 = vmatprep.subr.bf16.mxu1 %v4331_v8 }
 0x430   :  { %4081 = vmatpush3.bf16.msra.mxu1 %v4333_v0 }
 0x466   :  { %v2730_v13 = vpop.f32.mrb[8].mxu1 }
 0x467   :  { %v4096_v14 = vadd.f32 %v2730_v13, %v1180_v40  ;;  %v2816_v15 = vpop.f32.mrb[12].mxu0  ;;  %v2732_v16 = vpop.f32.mrb[9].mxu1 }
 0x468   :  { %v4100_v17 = vadd.f32 %v2816_v15, %v1188_v11  ;;  %v4097_v18 = vadd.f32 %v2732_v16, %v1184_v12  ;;  %v2818_v19 = vpop.f32.mrb[13].mxu0  ;;  %v2734_v20 = vpop.f32.mrb[10].mxu1 }
 0x469   :  { %v2829_v21 = vmul.f32 0.2, %v4096_v14  ;;  %v4101_v22 = vadd.f32 %v2818_v19, %v1192_v5  ;;  %v4098_v23 = vadd.f32 %v2734_v20, %v1180_v40  ;;  %v2820_v37 = vpop.f32.mrb[14].mxu0  ;;  %v2736_v24 = vpop.f32.mrb[11].mxu1 }
 0x46a   :  { %v2831_v25 = vmul.f32 0.2, %v4100_v17  ;;  %v2830_v26 = vmul.f32 0.2, %v4097_v18  ;;  %v4102_v27 = vadd.f32 %v2820_v37, %v1188_v11  ;;  %v4099_v28 = vadd.f32 %v2736_v24, %v1184_v12  ;;  %v2822_v51 = vpop.f32.mrb[15].mxu0 }
 0x46b   :  { %v2832_v29 = vmul.f32 0.2, %v4101_v22  ;;  %v2837_v55 = vmul.f32 0.2, %v4098_v23  ;;  %v4103_v30 = vadd.f32 %v2822_v51, %v1192_v5  ;;  %v2845_v33 = vmax.f32 %v4096_v14, %v2829_v21 }
 0x46c   :  { %v2839_v31 = vmul.f32 0.2, %v4102_v27  ;;  %v2838_v32 = vmul.f32 0.2, %v4099_v28  ;;  %v2847_v36 = vmax.f32 %v4100_v17, %v2831_v25  ;;  %v2846_v39 = vmax.f32 %v4097_v18, %v2830_v26 }
 0x46d   :  { %v2853_v34 = vmax.f32 %v4098_v23, %v2837_v55  ;;  %v2840_v35 = vmul.f32 0.2, %v4103_v30  ;;  %v2848_v47 = vmax.f32 %v4101_v22, %v2832_v29 }
 0x46e   :  { %v2855_v48 = vmax.f32 %v4102_v27, %v2839_v31  ;;  %v2854_v41 = vmax.f32 %v4099_v28, %v2838_v32 }
 0x46f   :  { %v2861_v42 = vpack.c.bf16 %v2853_v34, %v2845_v33  ;;  %v2856_v43 = vmax.f32 %v4103_v30, %v2840_v35 }
 0x470   :  { %v2863_v44 = vpack.c.bf16 %v2855_v48, %v2847_v36  ;;  %v2862_v45 = vpack.c.bf16 %v2854_v41, %v2846_v39 }
 0x471   :  { %v2864_v49 = vpack.c.bf16 %v2856_v43, %v2848_v47 }
 0x472   :  { %3498 = vmatprep.mubr.bf16.mxu0 %v2862_v45 }
 0x473   :  { %3539 = vmatprep.mubr.bf16.mxu1 %v2864_v49  ;;  %3499 = vmatmul.mubr.bf16.vlgmr.msra.gmra.mrb[16].mxu0 %v2861_v42 }
 0x474   :  { %3540 = vmatmul.mubr.bf16.vlgmr.msra.gmra.mrb[20].mxu1 %v2863_v44 }
 0x4c6   :  { %v4016_v50 = vpop.f32.mrb[12].mxu1 }
 0x4c7   :  { %v4017_v52 = vpop.f32.mrb[13].mxu1 }
 0x4c8   :  { %v4018_v46 = vadd.f32 %v4017_v52, %v4016_v50  ;;  %v4019_v53 = vpop.f32.mrb[14].mxu1 }
 0x4c9   :  { %v4020_v54 = vpop.f32.mrb[15].mxu1 }
 0x4ca   :  { %v4021_v56 = vadd.f32 %v4020_v54, %v4019_v53  ;;  %v3419_v60 = vadd.f32 %v4018_v46, %v3926_v57 }
 0x4cc   :  { %v3422_v2 = vadd.f32 %v4021_v56, %v3926_v57 }
 0x4e6   :  { %v4038_v58 = vpop.f32.mrb[16].mxu1 }
 0x4e7   :  { %v4039_v59 = vpop.f32.mrb[17].mxu1 }
 0x4e8   :  { %v4040_v61 = vadd.f32 %v4039_v59, %v4038_v58  ;;  %v4041_v62 = vpop.f32.mrb[18].mxu1 }
 0x4e9   :  { %v4042_v63 = vpop.f32.mrb[19].mxu1 }
 0x4ea   :  { %v3460_v4 = vadd.f32 %v4040_v61, %v3419_v60  ;;  %v4043_v6 = vadd.f32 %v4042_v63, %v4041_v62 }
 0x4ec   :  { %v3463_v7 = vadd.f32 %v4043_v6, %v3422_v2 }
 0x546   :  { %v4060_v38 = vpop.f32.mrb[16].mxu0 }
 0x547   :  { %v4082_v8 = vpop.f32.mrb[20].mxu1  ;;  %v4061_v0 = vpop.f32.mrb[17].mxu0 }
 0x548   :  { %v4062_v1 = vadd.f32 %v4061_v0, %v4060_v38  ;;  %v4083_v3 = vpop.f32.mrb[21].mxu1  ;;  %v4063_v9 = vpop.f32.mrb[18].mxu0 }
 0x549   :  { %v4084_v10 = vadd.f32 %v4083_v3, %v4082_v8  ;;  %v4085_v40 = vpop.f32.mrb[22].mxu1  ;;  %v4064_v11 = vpop.f32.mrb[19].mxu0 }
 0x54a   :  { %v3501_v12 = vadd.f32 %v4062_v1, %v3460_v4  ;;  %v4065_v5 = vadd.f32 %v4064_v11, %v4063_v9  ;;  %v4086_v13 = vpop.f32.mrb[23].mxu1 }
 0x54b   :  { %v4087_v14 = vadd.f32 %v4086_v13, %v4085_v40 }
 0x54c   :  { %v3542_v15 = vadd.f32 %v4084_v10, %v3501_v12  ;;  %v3504_v16 = vadd.f32 %v4065_v5, %v3463_v7 }
 0x54e   :  { %v3545_v17 = vadd.f32 %v4087_v14, %v3504_v16  ;;  %4334 = vtanh.f32 %v3542_v15 }
 0x550   :  { %4336 = vtanh.f32 %v3545_v17 }
 0x558   :  { %v4335_v18 = vpop.eup %4334 }
 0x55a   :  { %v4337_v19 = vpop.eup %4336 }
 0x55b   :  { %v3998_v20 = vpack.c.bf16 %v4337_v19, %v4335_v18 }
 0x55d   :  { %3999 = vst [vmem:[#allocation14] sm:$0xff] %v3998_v20  }
 0x55e   :  { %4503 = shalt.err (!%p4500_p4)
}
 0x55f   :  { %s4504_s20 = scalar_lea.hbm %s4825_s11, 128 }
 0x560   :  { %p4505_p5 = scmp.ne.s32.totalorder %s4825_s11, %s4504_s20  ;;  %p4508_p6 = scmp.lt.u32.totalorder %s4504_s20, %s4825_s11 }
 0x562   :  { %p4510_p7 = pnand %p4508_p6, %p4505_p5 }
 0x564   :  { %4513 = shalt.err (!%p4510_p7)
}
 0x565   :  { %3571 = dma.vmem_to_hbm [thread:$0]  %s3566_s5, 128, %s4825_s11, [#allocation4], %s4534_s7, %s4534_s7, %s4535_s26  }
 0x566   :  { %4522 = dma.done.wait [#allocation4], 128  }
 0x567   :  { %4523 = vsyncadd [#allocation4], 4294967168 }
 0x568   :  { %3575 = vsyncpa [#allocation3], 1 }
 0x569   :  { %3576 = vsyncpa [#allocation6], 1 }
 0x56a   :  { %3577 = vsyncpa [#allocation9], 1 }
 0x56b   :  { %3578 = vsyncpa [#allocation12], 1 }
 0x56c   :  { %3579 = vsyncpa [#allocation4], 1 }

</bundles_post_ra>
